<compile_context>
chip_gen: v7x
topology: tpu7x:2x2x1
jax: 0.10.0
libtpu: 0.0.40
codegen_flags: <defaults>
</compile_context>

<pallas_src>
import functools

import jax
import jax.numpy as jnp
from jax.experimental import pallas as pl
from jax.experimental.pallas import tpu as pltpu


# ----------------------------------------------------------------------------
# Model config (scaled-down analog of BERT: 768->128 hidden, 12->2 layers)
# ----------------------------------------------------------------------------
VOCAB = 64
MAX_POS = 32
HIDDEN = 128
HEADS = 4
HEAD_DIM = HIDDEN // HEADS
INTERMEDIATE = 256
LAYERS = 2
CLS_H = 100          # classifier hidden size in the original module
CLS_H_PAD = 128      # lane-aligned zero padding -> numerically identical
CLS_OUT = 2
CLS_OUT_PAD = 128    # lane-dense output store; sliced back to 2 in the wrapper


# ----------------------------------------------------------------------------
# Fused embedding + encoder + classifier kernel
# ----------------------------------------------------------------------------
def _ln_f32(x, g, b, eps=1e-12):
    """Row-wise LayerNorm in f32. g/b broadcast over rows."""
    mean = jnp.mean(x, axis=-1, keepdims=True)
    var = jnp.mean(jnp.square(x - mean), axis=-1, keepdims=True)
    return (x - mean) * jax.lax.rsqrt(var + eps) * g + b


def _encoder_cls_kernel(
    # scalar prefetch ------------------------------------------------------
    ids_ref,                       # SMEM (B*S,) int32 token ids
    # inputs ---------------------------------------------------------------
    neg_mask_ref,                  # (B, S)        f32 additive mask (1-m)*-1e4
    word_emb_ref,                  # (VOCAB, H)    f32
    pos_emb_ref,                   # (MAX_POS, H)  f32
    type_row_ref,                  # (1, H)        f32 (token_type_ids == 0)
    emb_ln_g_ref, emb_ln_b_ref,    # (1, H)        f32
    w_qkv_ref, b_qkv_ref,          # (1, H, 3H) bf16 / (1, 1, 3H) f32
    w_o_ref, b_o_ref,              # (1, H, H)  bf16 / (1, 1, H)  f32
    ln1_g_ref, ln1_b_ref,          # (1, 1, H)     f32
    w_in_ref, b_in_ref,            # (1, H, I)  bf16 / (1, 1, I)  f32
    w_out_ref, b_out_ref,          # (1, I, H)  bf16 / (1, 1, H)  f32
    ln2_g_ref, ln2_b_ref,          # (1, 1, H)     f32
    cls_w1_ref, cls_b1_ref,        # (H, 128) bf16 / (1, 128) f32
    cls_w2_ref, cls_b2_ref,        # (128, 128) bf16 / (1, 128) f32
    # output ---------------------------------------------------------------
    logits_ref,                    # (B, CLS_OUT_PAD) f32
    # scratch ----------------------------------------------------------------
    h_ref,                         # VMEM (B*S, H) f32 — resident across layers
    ctx_ref,                       # VMEM (B*S, H) f32 — attention context
    *, batch, seq):
    l = pl.program_id(0)

    # ---- layer 0 only: in-kernel embedding gather + embedding LayerNorm
    @pl.when(l == 0)
    def _init():
        type_row = type_row_ref[...]                       # (1, H)

        @pl.loop(0, batch * seq)
        def _gather(r):
            tid = ids_ref[r]                               # SMEM scalar read
            srow = r % seq                                 # position index
            h_ref[pl.ds(r, 1), :] = (word_emb_ref[pl.ds(tid, 1), :]
                                     + pos_emb_ref[pl.ds(srow, 1), :]
                                     + type_row)

        h_ref[...] = _ln_f32(h_ref[...], emb_ln_g_ref[...], emb_ln_b_ref[...])

    h = h_ref[...]                                         # (BS, H) f32

    # ---- fused QKV projection: one (H, 3H) bf16 MXU matmul, f32 accumulate.
    # NOTE: 1/sqrt(HEAD_DIM) is already folded into the Q third of w_qkv.
    qkv = jnp.dot(h.astype(jnp.bfloat16), w_qkv_ref[0],
                  preferred_element_type=jnp.float32) + b_qkv_ref[0]
    q = qkv[:, 0 * HIDDEN:1 * HIDDEN]
    k = qkv[:, 1 * HIDDEN:2 * HIDDEN]
    v = qkv[:, 2 * HIDDEN:3 * HIDDEN]

    # ---- attention: heads are contiguous 32-lane slices of the hidden axis.
    # Per-(batch, head) 2-D matmuls, statically unrolled (B*HEADS small).
    # Head context blocks are written straight into ctx_ref (no concatenates).
    for b in range(batch):
        r0 = b * seq
        q_b = q[r0:r0 + seq, :]
        k_b = k[r0:r0 + seq, :]
        v_b = v[r0:r0 + seq, :]
        # broadcast the additive mask row ONCE per batch (not per head)
        mrow = jnp.broadcast_to(neg_mask_ref[b:b + 1, :], (seq, seq))
        for hd in range(HEADS):
            c0 = hd * HEAD_DIM
            qh = q_b[:, c0:c0 + HEAD_DIM]                  # (S, Dh)
            kh = k_b[:, c0:c0 + HEAD_DIM]
            vh = v_b[:, c0:c0 + HEAD_DIM]
            s = jnp.dot(qh, kh.T, preferred_element_type=jnp.float32) + mrow
            s = s - jnp.max(s, axis=-1, keepdims=True)     # keep: untrusted inputs
            p = jnp.exp(s)
            p = p * pl.reciprocal(jnp.sum(p, axis=-1, keepdims=True),
                                  approx=True)
            ctx_ref[r0:r0 + seq, c0:c0 + HEAD_DIM] = jnp.dot(
                p, vh, preferred_element_type=jnp.float32)

    ctx = ctx_ref[...]                                     # (BS, H) f32

    # ---- attention output projection + residual folded into LayerNorm
    attn_out = jnp.dot(ctx.astype(jnp.bfloat16), w_o_ref[0],
                       preferred_element_type=jnp.float32) + b_o_ref[0]
    h1 = _ln_f32(h + attn_out, ln1_g_ref[0], ln1_b_ref[0])

    # ---- feed-forward block (GELU in f32) + residual folded into LayerNorm
    inter = jnp.dot(h1.astype(jnp.bfloat16), w_in_ref[0],
                    preferred_element_type=jnp.float32) + b_in_ref[0]
    # TODO(synk): HF 'gelu' is the exact erf form; the tanh approximation is
    # used here (matches jax.nn.gelu default).
    inter = jax.nn.gelu(inter, approximate=True)
    ffn_out = jnp.dot(inter.astype(jnp.bfloat16), w_out_ref[0],
                      preferred_element_type=jnp.float32) + b_out_ref[0]
    h2 = _ln_f32(h1 + ffn_out, ln2_g_ref[0], ln2_b_ref[0])
    h_ref[...] = h2                                        # carry to next layer

    # ---- last layer only: CLS token + classifier head (Linear->ReLU->Linear)
    @pl.when(l == pl.num_programs(0) - 1)
    def _classify():
        cls = jnp.concatenate(
            [h2[b * seq:b * seq + 1, :] for b in range(batch)], axis=0)  # (B, H)
        hid = jnp.dot(cls.astype(jnp.bfloat16), cls_w1_ref[...],
                      preferred_element_type=jnp.float32) + cls_b1_ref[...]
        hid = jnp.maximum(hid, 0.0)
        logits_ref[...] = jnp.dot(hid.astype(jnp.bfloat16), cls_w2_ref[...],
                                  preferred_element_type=jnp.float32) + cls_b2_ref[...]


# ----------------------------------------------------------------------------
# Deterministic synthetic parameters (stacked per-layer weights, bf16 matmul
# operands, attention scale folded into Wq, zero-padded classifier weights)
# ----------------------------------------------------------------------------
def init_params(key):
    def nrm(k, shape, scale=0.02):
        return scale * jax.random.normal(k, shape, dtype=jnp.float32)

    keys = iter(jax.random.split(key, 3 + LAYERS * 6 + 2))
    attn_scale = 1.0 / (HEAD_DIM ** 0.5)

    p = {
        "word_emb": nrm(next(keys), (VOCAB, HIDDEN)),
        "pos_emb": nrm(next(keys), (MAX_POS, HIDDEN)),
        "type_emb": nrm(next(keys), (2, HIDDEN)),
        "emb_ln_g": jnp.ones((1, HIDDEN), jnp.float32),
        "emb_ln_b": jnp.zeros((1, HIDDEN), jnp.float32),
    }

    w_qkv, w_o, w_in, w_out = [], [], [], []
    for _ in range(LAYERS):
        # 1/sqrt(HEAD_DIM) folded into the logical Wq (and its zero bias)
        wq = nrm(next(keys), (HIDDEN, HIDDEN)) * attn_scale
        wk = nrm(next(keys), (HIDDEN, HIDDEN))
        wv = nrm(next(keys), (HIDDEN, HIDDEN))
        w_qkv.append(jnp.concatenate([wq, wk, wv], axis=1))   # (H, 3H)
        w_o.append(nrm(next(keys), (HIDDEN, HIDDEN)))
        w_in.append(nrm(next(keys), (HIDDEN, INTERMEDIATE)))
        w_out.append(nrm(next(keys), (INTERMEDIATE, HIDDEN)))

    p["w_qkv"] = jnp.stack(w_qkv).astype(jnp.bfloat16)        # (L, H, 3H)
    p["b_qkv"] = jnp.zeros((LAYERS, 1, 3 * HIDDEN), jnp.float32)
    p["w_o"] = jnp.stack(w_o).astype(jnp.bfloat16)            # (L, H, H)
    p["b_o"] = jnp.zeros((LAYERS, 1, HIDDEN), jnp.float32)
    p["ln1_g"] = jnp.ones((LAYERS, 1, HIDDEN), jnp.float32)
    p["ln1_b"] = jnp.zeros((LAYERS, 1, HIDDEN), jnp.float32)
    p["w_in"] = jnp.stack(w_in).astype(jnp.bfloat16)          # (L, H, I)
    p["b_in"] = jnp.zeros((LAYERS, 1, INTERMEDIATE), jnp.float32)
    p["w_out"] = jnp.stack(w_out).astype(jnp.bfloat16)        # (L, I, H)
    p["b_out"] = jnp.zeros((LAYERS, 1, HIDDEN), jnp.float32)
    p["ln2_g"] = jnp.ones((LAYERS, 1, HIDDEN), jnp.float32)
    p["ln2_b"] = jnp.zeros((LAYERS, 1, HIDDEN), jnp.float32)

    # classifier: logical (H, 100) / (100, 2); zero-padded to lane-aligned
    # 128/128 (numerically identical), pre-cast to bf16 for the MXU.
    cls_w1 = nrm(next(keys), (HIDDEN, CLS_H))
    cls_w2 = nrm(next(keys), (CLS_H, CLS_OUT))
    p["cls_w1"] = jnp.pad(cls_w1, ((0, 0), (0, CLS_H_PAD - CLS_H))
                          ).astype(jnp.bfloat16)
    p["cls_b1"] = jnp.zeros((1, CLS_H_PAD), jnp.float32)
    p["cls_w2"] = jnp.pad(cls_w2, ((0, CLS_H_PAD - CLS_H),
                                   (0, CLS_OUT_PAD - CLS_OUT))
                          ).astype(jnp.bfloat16)
    p["cls_b2"] = jnp.zeros((1, CLS_OUT_PAD), jnp.float32)
    return p


# ----------------------------------------------------------------------------
# Forward pass: the whole model is one pallas_call (XLA side only builds the
# additive mask and slices the padded logits back to 2 columns).
# ----------------------------------------------------------------------------
@jax.jit
def bert_classifier_forward(params, input_ids, attention_mask):
    B, S = input_ids.shape
    ids_flat = input_ids.reshape(B * S).astype(jnp.int32)
    # HF-style additive mask, computed once (hoisted out of the layer loop).
    neg_mask = (1.0 - attention_mask.astype(jnp.float32)) * -10000.0
    type_row = params["type_emb"][0:1]      # token_type_ids == 0 everywhere

    kernel = functools.partial(_encoder_cls_kernel, batch=B, seq=S)

    rep2 = lambda l, ids: (0, 0)      # shared across all layers
    lay3 = lambda l, ids: (l, 0, 0)   # per-layer block selected by grid index

    logits_pad = pl.pallas_call(
        kernel,
        out_shape=jax.ShapeDtypeStruct((B, CLS_OUT_PAD), jnp.float32),
        grid_spec=pltpu.PrefetchScalarGridSpec(
            num_scalar_prefetch=1,                              # input_ids -> SMEM
            grid=(LAYERS,),
            in_specs=[
                pl.BlockSpec((B, S), rep2),                         # neg_mask
                pl.BlockSpec((VOCAB, HIDDEN), rep2),                # word_emb
                pl.BlockSpec((MAX_POS, HIDDEN), rep2),              # pos_emb
                pl.BlockSpec((1, HIDDEN), rep2),                    # type_row
                pl.BlockSpec((1, HIDDEN), rep2),                    # emb_ln_g
                pl.BlockSpec((1, HIDDEN), rep2),                    # emb_ln_b
                pl.BlockSpec((1, HIDDEN, 3 * HIDDEN), lay3),        # w_qkv
                pl.BlockSpec((1, 1, 3 * HIDDEN), lay3),             # b_qkv
                pl.BlockSpec((1, HIDDEN, HIDDEN), lay3),            # w_o
                pl.BlockSpec((1, 1, HIDDEN), lay3),                 # b_o
                pl.BlockSpec((1, 1, HIDDEN), lay3),                 # ln1_g
                pl.BlockSpec((1, 1, HIDDEN), lay3),                 # ln1_b
                pl.BlockSpec((1, HIDDEN, INTERMEDIATE), lay3),      # w_in
                pl.BlockSpec((1, 1, INTERMEDIATE), lay3),           # b_in
                pl.BlockSpec((1, INTERMEDIATE, HIDDEN), lay3),      # w_out
                pl.BlockSpec((1, 1, HIDDEN), lay3),                 # b_out
                pl.BlockSpec((1, 1, HIDDEN), lay3),                 # ln2_g
                pl.BlockSpec((1, 1, HIDDEN), lay3),                 # ln2_b
                pl.BlockSpec((HIDDEN, CLS_H_PAD), rep2),            # cls_w1
                pl.BlockSpec((1, CLS_H_PAD), rep2),                 # cls_b1
                pl.BlockSpec((CLS_H_PAD, CLS_OUT_PAD), rep2),       # cls_w2
                pl.BlockSpec((1, CLS_OUT_PAD), rep2),               # cls_b2
            ],
            out_specs=pl.BlockSpec((B, CLS_OUT_PAD), rep2),
            scratch_shapes=[
                pltpu.VMEM((B * S, HIDDEN), jnp.float32),   # resident hidden state
                pltpu.VMEM((B * S, HIDDEN), jnp.float32),   # attention context
            ],
        ),
        # Layer axis carries the hidden state -> must stay sequential.
        compiler_params=pltpu.CompilerParams(
            dimension_semantics=("arbitrary",),
        ),
    )(
        ids_flat, neg_mask,
        params["word_emb"], params["pos_emb"], type_row,
        params["emb_ln_g"], params["emb_ln_b"],
        params["w_qkv"], params["b_qkv"],
        params["w_o"], params["b_o"],
        params["ln1_g"], params["ln1_b"],
        params["w_in"], params["b_in"],
        params["w_out"], params["b_out"],
        params["ln2_g"], params["ln2_b"],
        params["cls_w1"], params["cls_b1"],
        params["cls_w2"], params["cls_b2"],
    )
    return logits_pad[:, :CLS_OUT]                              # (B, CLS_OUT)


if __name__ == "__main__":
    key = jax.random.PRNGKey(0)
    k_param, k_ids = jax.random.split(key, 2)

    B, S = 2, 8
    params = init_params(k_param)
    input_ids = jax.random.randint(k_ids, (B, S), 0, VOCAB, dtype=jnp.int32)
    # mask: first row fully valid, second row has 2 padding positions
    attention_mask = jnp.array(
        [[1, 1, 1, 1, 1, 1, 1, 1],
         [1, 1, 1, 1, 1, 1, 0, 0]], dtype=jnp.int32)

    logits = bert_classifier_forward(params, input_ids, attention_mask)
    logits = jax.block_until_ready(logits)
    assert logits.shape == (B, CLS_OUT) and logits.dtype == jnp.float32
    assert bool(jnp.all(jnp.isfinite(logits)))
    print("KERNEL_OK")
</pallas_src>

<mosaic_0001>
module attributes {stable_mosaic.version = 11 : i64} {
  func.func @_encoder_cls_kernel(%arg0: i32, %arg1: memref<16xi32, #tpu.memory_space<smem>>, %arg2: memref<2x8xf32, #tpu.memory_space<vmem>>, %arg3: memref<64x128xf32, #tpu.memory_space<vmem>>, %arg4: memref<32x128xf32, #tpu.memory_space<vmem>>, %arg5: memref<1x128xf32, #tpu.memory_space<vmem>>, %arg6: memref<1x128xf32, #tpu.memory_space<vmem>>, %arg7: memref<1x128xf32, #tpu.memory_space<vmem>>, %arg8: memref<1x128x384xbf16, #tpu.memory_space<vmem>>, %arg9: memref<1x1x384xf32, #tpu.memory_space<vmem>>, %arg10: memref<1x128x128xbf16, #tpu.memory_space<vmem>>, %arg11: memref<1x1x128xf32, #tpu.memory_space<vmem>>, %arg12: memref<1x1x128xf32, #tpu.memory_space<vmem>>, %arg13: memref<1x1x128xf32, #tpu.memory_space<vmem>>, %arg14: memref<1x128x256xbf16, #tpu.memory_space<vmem>>, %arg15: memref<1x1x256xf32, #tpu.memory_space<vmem>>, %arg16: memref<1x256x128xbf16, #tpu.memory_space<vmem>>, %arg17: memref<1x1x128xf32, #tpu.memory_space<vmem>>, %arg18: memref<1x1x128xf32, #tpu.memory_space<vmem>>, %arg19: memref<1x1x128xf32, #tpu.memory_space<vmem>>, %arg20: memref<128x128xbf16, #tpu.memory_space<vmem>>, %arg21: memref<1x128xf32, #tpu.memory_space<vmem>>, %arg22: memref<128x128xbf16, #tpu.memory_space<vmem>>, %arg23: memref<1x128xf32, #tpu.memory_space<vmem>>, %arg24: memref<2x128xf32, #tpu.memory_space<vmem>>, %arg25: memref<16x128xf32, #tpu.memory_space<vmem>>, %arg26: memref<16x128xf32, #tpu.memory_space<vmem>>) attributes {dimension_semantics = [#tpu.dimension_semantics<arbitrary>], iteration_bounds = array<i64: 2>, scalar_prefetch = 1 : i64, scratch_operands = 2 : i64, tpu.core_type = #tpu.core_type<tc>, window_params = [{pipeline_mode = #tpu.pipeline_mode<synchronous>, transform_indices = @transform_0, window_bounds = array<i64: 2, 8>}, {pipeline_mode = #tpu.pipeline_mode<synchronous>, transform_indices = @transform_1, window_bounds = array<i64: 64, 128>}, {pipeline_mode = #tpu.pipeline_mode<synchronous>, transform_indices = @transform_2, window_bounds = array<i64: 32, 128>}, {pipeline_mode = #tpu.pipeline_mode<synchronous>, transform_indices = @transform_3, window_bounds = array<i64: 1, 128>}, {pipeline_mode = #tpu.pipeline_mode<synchronous>, transform_indices = @transform_4, window_bounds = array<i64: 1, 128>}, {pipeline_mode = #tpu.pipeline_mode<synchronous>, transform_indices = @transform_5, window_bounds = array<i64: 1, 128>}, {transform_indices = @transform_6, window_bounds = array<i64: 1, 128, 384>}, {transform_indices = @transform_7, window_bounds = array<i64: 1, 1, 384>}, {transform_indices = @transform_8, window_bounds = array<i64: 1, 128, 128>}, {transform_indices = @transform_9, window_bounds = array<i64: 1, 1, 128>}, {transform_indices = @transform_10, window_bounds = array<i64: 1, 1, 128>}, {transform_indices = @transform_11, window_bounds = array<i64: 1, 1, 128>}, {transform_indices = @transform_12, window_bounds = array<i64: 1, 128, 256>}, {transform_indices = @transform_13, window_bounds = array<i64: 1, 1, 256>}, {transform_indices = @transform_14, window_bounds = array<i64: 1, 256, 128>}, {transform_indices = @transform_15, window_bounds = array<i64: 1, 1, 128>}, {transform_indices = @transform_16, window_bounds = array<i64: 1, 1, 128>}, {transform_indices = @transform_17, window_bounds = array<i64: 1, 1, 128>}, {pipeline_mode = #tpu.pipeline_mode<synchronous>, transform_indices = @transform_18, window_bounds = array<i64: 128, 128>}, {pipeline_mode = #tpu.pipeline_mode<synchronous>, transform_indices = @transform_19, window_bounds = array<i64: 1, 128>}, {pipeline_mode = #tpu.pipeline_mode<synchronous>, transform_indices = @transform_20, window_bounds = array<i64: 128, 128>}, {pipeline_mode = #tpu.pipeline_mode<synchronous>, transform_indices = @transform_21, window_bounds = array<i64: 1, 128>}, {pipeline_mode = #tpu.pipeline_mode<synchronous>, transform_indices = @transform_22, window_bounds = array<i64: 2, 128>}]} {
    %c0_i32 = arith.constant 0 : i32
    %0 = arith.cmpi eq, %arg0, %c0_i32 : i32
    %1 = arith.extui %0 : i1 to i32
    %c0_i32_0 = arith.constant 0 : i32
    %2 = arith.cmpi ne, %1, %c0_i32_0 : i32
    scf.if %2 {
      %c0_107 = arith.constant 0 : index
      %c0_108 = arith.constant 0 : index
      %267 = vector.load %arg5[%c0_107, %c0_108] : memref<1x128xf32, #tpu.memory_space<vmem>>, vector<1x128xf32>
      %c0_i32_109 = arith.constant 0 : i32
      %c16_i32 = arith.constant 16 : i32
      %268 = arith.addi %c0_i32_109, %c16_i32 : i32
      %c1_i32_110 = arith.constant 1 : i32
      scf.for %arg27 = %c0_i32_109 to %268 step %c1_i32_110  : i32 {
        %c1_i32_125 = arith.constant 1 : i32
        %295 = arith.muli %arg27, %c1_i32_125 : i32
        %c0_i32_126 = arith.constant 0 : i32
        %296 = arith.addi %c0_i32_126, %295 : i32
        %297 = arith.index_cast %296 : i32 to index
        %298 = memref.load %arg1[%297] : memref<16xi32, #tpu.memory_space<smem>>
        %c8_i32 = arith.constant 8 : i32
        %c0_i32_127 = arith.constant 0 : i32
        %299 = arith.cmpi eq, %c8_i32, %c0_i32_127 : i32
        %c1_i32_128 = arith.constant 1 : i32
        %300 = arith.select %299, %c1_i32_128, %c8_i32 : i32
        %301 = arith.remsi %296, %300 : i32
        %c0_i32_129 = arith.constant 0 : i32
        %302 = arith.cmpi ne, %301, %c0_i32_129 : i32
        %c0_i32_130 = arith.constant 0 : i32
        %303 = arith.cmpi slt, %301, %c0_i32_130 : i32
        %c0_i32_131 = arith.constant 0 : i32
        %304 = arith.cmpi slt, %300, %c0_i32_131 : i32
        %305 = arith.xori %303, %304 : i1
        %306 = arith.andi %305, %302 : i1
        %307 = arith.addi %301, %300 : i32
        %308 = arith.select %306, %307, %301 : i32
        %309 = arith.index_cast %298 : i32 to index
        %c0_132 = arith.constant 0 : index
        %310 = vector.load %arg3[%309, %c0_132] : memref<64x128xf32, #tpu.memory_space<vmem>>, vector<1x128xf32>
        %311 = arith.index_cast %308 : i32 to index
        %c0_133 = arith.constant 0 : index
        %312 = vector.load %arg4[%311, %c0_133] : memref<32x128xf32, #tpu.memory_space<vmem>>, vector<1x128xf32>
        %313 = arith.addf %310, %312 : vector<1x128xf32>
        %314 = arith.addf %313, %267 : vector<1x128xf32>
        %315 = arith.index_cast %296 : i32 to index
        %c0_134 = arith.constant 0 : index
        %316 = vector.load %arg25[%315, %c0_134] : memref<16x128xf32, #tpu.memory_space<vmem>>, vector<1x128xf32>
        tpu.vector_store %arg25[%315, %c0_134], %314 {strides = array<i32>} : memref<16x128xf32, #tpu.memory_space<vmem>>, vector<1x128xf32>,
      }
      %c16_i32_111 = arith.constant 16 : i32
      %c0_112 = arith.constant 0 : index
      %c0_113 = arith.constant 0 : index
      %269 = vector.load %arg25[%c0_112, %c0_113] : memref<16x128xf32, #tpu.memory_space<vmem>>, vector<16x128xf32>
      %c0_114 = arith.constant 0 : index
      %c0_115 = arith.constant 0 : index
      %270 = vector.load %arg6[%c0_114, %c0_115] : memref<1x128xf32, #tpu.memory_space<vmem>>, vector<1x128xf32>
      %c0_116 = arith.constant 0 : index
      %c0_117 = arith.constant 0 : index
      %271 = vector.load %arg7[%c0_116, %c0_117] : memref<1x128xf32, #tpu.memory_space<vmem>>, vector<1x128xf32>
      %cst_118 = arith.constant dense<0.000000e+00> : vector<16xf32>
      %272 = vector.multi_reduction <add>, %269, %cst_118 [1] : vector<16x128xf32> to vector<16xf32>
      %273 = vector.shape_cast %272 : vector<16xf32> to vector<16x1xf32>
      %cst_119 = arith.constant 1.280000e+02 : f32
      %274 = vector.broadcast %cst_119 : f32 to vector<16x1xf32>
      %275 = arith.divf %273, %274 : vector<16x1xf32>
      %276 = vector.broadcast %275 : vector<16x1xf32> to vector<16x128xf32>
      %277 = arith.subf %269, %276 : vector<16x128xf32>
      %278 = arith.mulf %277, %277 : vector<16x128xf32>
      %cst_120 = arith.constant dense<0.000000e+00> : vector<16xf32>
      %279 = vector.multi_reduction <add>, %278, %cst_120 [1] : vector<16x128xf32> to vector<16xf32>
      %280 = vector.shape_cast %279 : vector<16xf32> to vector<16x1xf32>
      %cst_121 = arith.constant 1.280000e+02 : f32
      %281 = vector.broadcast %cst_121 : f32 to vector<16x1xf32>
      %282 = arith.divf %280, %281 : vector<16x1xf32>
      %283 = vector.broadcast %275 : vector<16x1xf32> to vector<16x128xf32>
      %284 = arith.subf %269, %283 : vector<16x128xf32>
      %cst_122 = arith.constant 9.99999996E-13 : f32
      %285 = vector.broadcast %cst_122 : f32 to vector<16x1xf32>
      %286 = arith.addf %282, %285 : vector<16x1xf32>
      %287 = math.rsqrt %286 : vector<16x1xf32>
      %288 = vector.broadcast %287 : vector<16x1xf32> to vector<16x128xf32>
      %289 = arith.mulf %284, %288 : vector<16x128xf32>
      %290 = vector.broadcast %270 : vector<1x128xf32> to vector<16x128xf32>
      %291 = arith.mulf %289, %290 : vector<16x128xf32>
      %292 = vector.broadcast %271 : vector<1x128xf32> to vector<16x128xf32>
      %293 = arith.addf %291, %292 : vector<16x128xf32>
      %c0_123 = arith.constant 0 : index
      %c0_124 = arith.constant 0 : index
      %294 = vector.load %arg25[%c0_123, %c0_124] : memref<16x128xf32, #tpu.memory_space<vmem>>, vector<16x128xf32>
      tpu.vector_store %arg25[%c0_123, %c0_124], %293 {strides = array<i32>} : memref<16x128xf32, #tpu.memory_space<vmem>>, vector<16x128xf32>,
    } else {
    }
    %c0 = arith.constant 0 : index
    %c0_1 = arith.constant 0 : index
    %3 = vector.load %arg25[%c0, %c0_1] : memref<16x128xf32, #tpu.memory_space<vmem>>, vector<16x128xf32>
    %4 = arith.truncf %3 : vector<16x128xf32> to vector<16x128xbf16>
    %c0_2 = arith.constant 0 : index
    %c0_3 = arith.constant 0 : index
    %c0_4 = arith.constant 0 : index
    %5 = vector.load %arg8[%c0_2, %c0_3, %c0_4] : memref<1x128x384xbf16, #tpu.memory_space<vmem>>, vector<1x128x384xbf16>
    %6 = vector.shape_cast %5 : vector<1x128x384xbf16> to vector<128x384xbf16>
    %cst = arith.constant dense<0.000000e+00> : vector<16x384xf32>
    %7 = tpu.matmul %4, %6, %cst {dimension_numbers = #tpu.dot_dimension_numbers<[1], [0], [0], [1], [0, 0, 1, 1], [], []>} : vector<16x128xbf16>, vector<128x384xbf16>, vector<16x384xf32> -> vector<16x384xf32>
    %c0_5 = arith.constant 0 : index
    %c0_6 = arith.constant 0 : index
    %c0_7 = arith.constant 0 : index
    %8 = vector.load %arg9[%c0_5, %c0_6, %c0_7] : memref<1x1x384xf32, #tpu.memory_space<vmem>>, vector<1x1x384xf32>
    %9 = vector.shape_cast %8 : vector<1x1x384xf32> to vector<1x384xf32>
    %10 = vector.broadcast %9 : vector<1x384xf32> to vector<16x384xf32>
    %11 = arith.addf %7, %10 : vector<16x384xf32>
    %12 = vector.extract_strided_slice %11 {offsets = [0, 0], sizes = [16, 128], strides = [1, 1]} : vector<16x384xf32> to vector<16x128xf32>
    %13 = vector.extract_strided_slice %11 {offsets = [0, 128], sizes = [16, 128], strides = [1, 1]} : vector<16x384xf32> to vector<16x128xf32>
    %14 = vector.extract_strided_slice %11 {offsets = [0, 256], sizes = [16, 128], strides = [1, 1]} : vector<16x384xf32> to vector<16x128xf32>
    %15 = vector.extract_strided_slice %12 {offsets = [0, 0], sizes = [8, 128], strides = [1, 1]} : vector<16x128xf32> to vector<8x128xf32>
    %16 = vector.extract_strided_slice %13 {offsets = [0, 0], sizes = [8, 128], strides = [1, 1]} : vector<16x128xf32> to vector<8x128xf32>
    %17 = vector.extract_strided_slice %14 {offsets = [0, 0], sizes = [8, 128], strides = [1, 1]} : vector<16x128xf32> to vector<8x128xf32>
    %c0_8 = arith.constant 0 : index
    %c0_9 = arith.constant 0 : index
    %18 = vector.load %arg2[%c0_8, %c0_9] : memref<2x8xf32, #tpu.memory_space<vmem>>, vector<1x8xf32>
    %19 = vector.shape_cast %18 : vector<1x8xf32> to vector<1x8xf32>
    %20 = vector.broadcast %19 : vector<1x8xf32> to vector<8x8xf32>
    %21 = vector.extract_strided_slice %15 {offsets = [0, 0], sizes = [8, 32], strides = [1, 1]} : vector<8x128xf32> to vector<8x32xf32>
    %22 = vector.extract_strided_slice %16 {offsets = [0, 0], sizes = [8, 32], strides = [1, 1]} : vector<8x128xf32> to vector<8x32xf32>
    %23 = vector.extract_strided_slice %17 {offsets = [0, 0], sizes = [8, 32], strides = [1, 1]} : vector<8x128xf32> to vector<8x32xf32>
    %24 = tpu.transpose %22, [1, 0] : vector<8x32xf32> -> vector<32x8xf32>
    %cst_10 = arith.constant dense<0.000000e+00> : vector<8x8xf32>
    %25 = tpu.matmul %21, %24, %cst_10 {dimension_numbers = #tpu.dot_dimension_numbers<[1], [0], [0], [1], [0, 0, 1, 1], [], []>} : vector<8x32xf32>, vector<32x8xf32>, vector<8x8xf32> -> vector<8x8xf32>
    %26 = arith.addf %25, %20 : vector<8x8xf32>
    %cst_11 = arith.constant dense<0xFF800000> : vector<8xf32>
    %27 = vector.multi_reduction <maximumf>, %26, %cst_11 [1] : vector<8x8xf32> to vector<8xf32>
    %28 = vector.shape_cast %27 : vector<8xf32> to vector<8x1xf32>
    %29 = vector.broadcast %28 : vector<8x1xf32> to vector<8x8xf32>
    %30 = arith.subf %26, %29 : vector<8x8xf32>
    %31 = math.exp %30 : vector<8x8xf32>
    %cst_12 = arith.constant dense<0.000000e+00> : vector<8xf32>
    %32 = vector.multi_reduction <add>, %31, %cst_12 [1] : vector<8x8xf32> to vector<8xf32>
    %33 = vector.shape_cast %32 : vector<8xf32> to vector<8x1xf32>
    %34 = tpu.reciprocal %33 {approx = true} : vector<8x1xf32> -> vector<8x1xf32>
    %35 = vector.broadcast %34 : vector<8x1xf32> to vector<8x8xf32>
    %36 = arith.mulf %31, %35 : vector<8x8xf32>
    %cst_13 = arith.constant dense<0.000000e+00> : vector<8x32xf32>
    %37 = tpu.matmul %36, %23, %cst_13 {dimension_numbers = #tpu.dot_dimension_numbers<[1], [0], [0], [1], [0, 0, 1, 1], [], []>} : vector<8x8xf32>, vector<8x32xf32>, vector<8x32xf32> -> vector<8x32xf32>
    %c0_14 = arith.constant 0 : index
    %c0_15 = arith.constant 0 : index
    %38 = vector.load %arg26[%c0_14, %c0_15] : memref<16x128xf32, #tpu.memory_space<vmem>>, vector<8x32xf32>
    tpu.vector_store %arg26[%c0_14, %c0_15], %37 {strides = array<i32>} : memref<16x128xf32, #tpu.memory_space<vmem>>, vector<8x32xf32>,
    %39 = vector.extract_strided_slice %15 {offsets = [0, 32], sizes = [8, 32], strides = [1, 1]} : vector<8x128xf32> to vector<8x32xf32>
    %40 = vector.extract_strided_slice %16 {offsets = [0, 32], sizes = [8, 32], strides = [1, 1]} : vector<8x128xf32> to vector<8x32xf32>
    %41 = vector.extract_strided_slice %17 {offsets = [0, 32], sizes = [8, 32], strides = [1, 1]} : vector<8x128xf32> to vector<8x32xf32>
    %42 = tpu.transpose %40, [1, 0] : vector<8x32xf32> -> vector<32x8xf32>
    %cst_16 = arith.constant dense<0.000000e+00> : vector<8x8xf32>
    %43 = tpu.matmul %39, %42, %cst_16 {dimension_numbers = #tpu.dot_dimension_numbers<[1], [0], [0], [1], [0, 0, 1, 1], [], []>} : vector<8x32xf32>, vector<32x8xf32>, vector<8x8xf32> -> vector<8x8xf32>
    %44 = arith.addf %43, %20 : vector<8x8xf32>
    %cst_17 = arith.constant dense<0xFF800000> : vector<8xf32>
    %45 = vector.multi_reduction <maximumf>, %44, %cst_17 [1] : vector<8x8xf32> to vector<8xf32>
    %46 = vector.shape_cast %45 : vector<8xf32> to vector<8x1xf32>
    %47 = vector.broadcast %46 : vector<8x1xf32> to vector<8x8xf32>
    %48 = arith.subf %44, %47 : vector<8x8xf32>
    %49 = math.exp %48 : vector<8x8xf32>
    %cst_18 = arith.constant dense<0.000000e+00> : vector<8xf32>
    %50 = vector.multi_reduction <add>, %49, %cst_18 [1] : vector<8x8xf32> to vector<8xf32>
    %51 = vector.shape_cast %50 : vector<8xf32> to vector<8x1xf32>
    %52 = tpu.reciprocal %51 {approx = true} : vector<8x1xf32> -> vector<8x1xf32>
    %53 = vector.broadcast %52 : vector<8x1xf32> to vector<8x8xf32>
    %54 = arith.mulf %49, %53 : vector<8x8xf32>
    %cst_19 = arith.constant dense<0.000000e+00> : vector<8x32xf32>
    %55 = tpu.matmul %54, %41, %cst_19 {dimension_numbers = #tpu.dot_dimension_numbers<[1], [0], [0], [1], [0, 0, 1, 1], [], []>} : vector<8x8xf32>, vector<8x32xf32>, vector<8x32xf32> -> vector<8x32xf32>
    %c0_20 = arith.constant 0 : index
    %c32 = arith.constant 32 : index
    %56 = vector.load %arg26[%c0_20, %c32] : memref<16x128xf32, #tpu.memory_space<vmem>>, vector<8x32xf32>
    tpu.vector_store %arg26[%c0_20, %c32], %55 {strides = array<i32>} : memref<16x128xf32, #tpu.memory_space<vmem>>, vector<8x32xf32>,
    %57 = vector.extract_strided_slice %15 {offsets = [0, 64], sizes = [8, 32], strides = [1, 1]} : vector<8x128xf32> to vector<8x32xf32>
    %58 = vector.extract_strided_slice %16 {offsets = [0, 64], sizes = [8, 32], strides = [1, 1]} : vector<8x128xf32> to vector<8x32xf32>
    %59 = vector.extract_strided_slice %17 {offsets = [0, 64], sizes = [8, 32], strides = [1, 1]} : vector<8x128xf32> to vector<8x32xf32>
    %60 = tpu.transpose %58, [1, 0] : vector<8x32xf32> -> vector<32x8xf32>
    %cst_21 = arith.constant dense<0.000000e+00> : vector<8x8xf32>
    %61 = tpu.matmul %57, %60, %cst_21 {dimension_numbers = #tpu.dot_dimension_numbers<[1], [0], [0], [1], [0, 0, 1, 1], [], []>} : vector<8x32xf32>, vector<32x8xf32>, vector<8x8xf32> -> vector<8x8xf32>
    %62 = arith.addf %61, %20 : vector<8x8xf32>
    %cst_22 = arith.constant dense<0xFF800000> : vector<8xf32>
    %63 = vector.multi_reduction <maximumf>, %62, %cst_22 [1] : vector<8x8xf32> to vector<8xf32>
    %64 = vector.shape_cast %63 : vector<8xf32> to vector<8x1xf32>
    %65 = vector.broadcast %64 : vector<8x1xf32> to vector<8x8xf32>
    %66 = arith.subf %62, %65 : vector<8x8xf32>
    %67 = math.exp %66 : vector<8x8xf32>
    %cst_23 = arith.constant dense<0.000000e+00> : vector<8xf32>
    %68 = vector.multi_reduction <add>, %67, %cst_23 [1] : vector<8x8xf32> to vector<8xf32>
    %69 = vector.shape_cast %68 : vector<8xf32> to vector<8x1xf32>
    %70 = tpu.reciprocal %69 {approx = true} : vector<8x1xf32> -> vector<8x1xf32>
    %71 = vector.broadcast %70 : vector<8x1xf32> to vector<8x8xf32>
    %72 = arith.mulf %67, %71 : vector<8x8xf32>
    %cst_24 = arith.constant dense<0.000000e+00> : vector<8x32xf32>
    %73 = tpu.matmul %72, %59, %cst_24 {dimension_numbers = #tpu.dot_dimension_numbers<[1], [0], [0], [1], [0, 0, 1, 1], [], []>} : vector<8x8xf32>, vector<8x32xf32>, vector<8x32xf32> -> vector<8x32xf32>
    %c0_25 = arith.constant 0 : index
    %c64 = arith.constant 64 : index
    %74 = vector.load %arg26[%c0_25, %c64] : memref<16x128xf32, #tpu.memory_space<vmem>>, vector<8x32xf32>
    tpu.vector_store %arg26[%c0_25, %c64], %73 {strides = array<i32>} : memref<16x128xf32, #tpu.memory_space<vmem>>, vector<8x32xf32>,
    %75 = vector.extract_strided_slice %15 {offsets = [0, 96], sizes = [8, 32], strides = [1, 1]} : vector<8x128xf32> to vector<8x32xf32>
    %76 = vector.extract_strided_slice %16 {offsets = [0, 96], sizes = [8, 32], strides = [1, 1]} : vector<8x128xf32> to vector<8x32xf32>
    %77 = vector.extract_strided_slice %17 {offsets = [0, 96], sizes = [8, 32], strides = [1, 1]} : vector<8x128xf32> to vector<8x32xf32>
    %78 = tpu.transpose %76, [1, 0] : vector<8x32xf32> -> vector<32x8xf32>
    %cst_26 = arith.constant dense<0.000000e+00> : vector<8x8xf32>
    %79 = tpu.matmul %75, %78, %cst_26 {dimension_numbers = #tpu.dot_dimension_numbers<[1], [0], [0], [1], [0, 0, 1, 1], [], []>} : vector<8x32xf32>, vector<32x8xf32>, vector<8x8xf32> -> vector<8x8xf32>
    %80 = arith.addf %79, %20 : vector<8x8xf32>
    %cst_27 = arith.constant dense<0xFF800000> : vector<8xf32>
    %81 = vector.multi_reduction <maximumf>, %80, %cst_27 [1] : vector<8x8xf32> to vector<8xf32>
    %82 = vector.shape_cast %81 : vector<8xf32> to vector<8x1xf32>
    %83 = vector.broadcast %82 : vector<8x1xf32> to vector<8x8xf32>
    %84 = arith.subf %80, %83 : vector<8x8xf32>
    %85 = math.exp %84 : vector<8x8xf32>
    %cst_28 = arith.constant dense<0.000000e+00> : vector<8xf32>
    %86 = vector.multi_reduction <add>, %85, %cst_28 [1] : vector<8x8xf32> to vector<8xf32>
    %87 = vector.shape_cast %86 : vector<8xf32> to vector<8x1xf32>
    %88 = tpu.reciprocal %87 {approx = true} : vector<8x1xf32> -> vector<8x1xf32>
    %89 = vector.broadcast %88 : vector<8x1xf32> to vector<8x8xf32>
    %90 = arith.mulf %85, %89 : vector<8x8xf32>
    %cst_29 = arith.constant dense<0.000000e+00> : vector<8x32xf32>
    %91 = tpu.matmul %90, %77, %cst_29 {dimension_numbers = #tpu.dot_dimension_numbers<[1], [0], [0], [1], [0, 0, 1, 1], [], []>} : vector<8x8xf32>, vector<8x32xf32>, vector<8x32xf32> -> vector<8x32xf32>
    %c0_30 = arith.constant 0 : index
    %c96 = arith.constant 96 : index
    %92 = vector.load %arg26[%c0_30, %c96] : memref<16x128xf32, #tpu.memory_space<vmem>>, vector<8x32xf32>
    tpu.vector_store %arg26[%c0_30, %c96], %91 {strides = array<i32>} : memref<16x128xf32, #tpu.memory_space<vmem>>, vector<8x32xf32>,
    %93 = vector.extract_strided_slice %12 {offsets = [8, 0], sizes = [8, 128], strides = [1, 1]} : vector<16x128xf32> to vector<8x128xf32>
    %94 = vector.extract_strided_slice %13 {offsets = [8, 0], sizes = [8, 128], strides = [1, 1]} : vector<16x128xf32> to vector<8x128xf32>
    %95 = vector.extract_strided_slice %14 {offsets = [8, 0], sizes = [8, 128], strides = [1, 1]} : vector<16x128xf32> to vector<8x128xf32>
    %c1 = arith.constant 1 : index
    %c0_31 = arith.constant 0 : index
    %96 = vector.load %arg2[%c1, %c0_31] : memref<2x8xf32, #tpu.memory_space<vmem>>, vector<1x8xf32>
    %97 = vector.shape_cast %96 : vector<1x8xf32> to vector<1x8xf32>
    %98 = vector.broadcast %97 : vector<1x8xf32> to vector<8x8xf32>
    %99 = vector.extract_strided_slice %93 {offsets = [0, 0], sizes = [8, 32], strides = [1, 1]} : vector<8x128xf32> to vector<8x32xf32>
    %100 = vector.extract_strided_slice %94 {offsets = [0, 0], sizes = [8, 32], strides = [1, 1]} : vector<8x128xf32> to vector<8x32xf32>
    %101 = vector.extract_strided_slice %95 {offsets = [0, 0], sizes = [8, 32], strides = [1, 1]} : vector<8x128xf32> to vector<8x32xf32>
    %102 = tpu.transpose %100, [1, 0] : vector<8x32xf32> -> vector<32x8xf32>
    %cst_32 = arith.constant dense<0.000000e+00> : vector<8x8xf32>
    %103 = tpu.matmul %99, %102, %cst_32 {dimension_numbers = #tpu.dot_dimension_numbers<[1], [0], [0], [1], [0, 0, 1, 1], [], []>} : vector<8x32xf32>, vector<32x8xf32>, vector<8x8xf32> -> vector<8x8xf32>
    %104 = arith.addf %103, %98 : vector<8x8xf32>
    %cst_33 = arith.constant dense<0xFF800000> : vector<8xf32>
    %105 = vector.multi_reduction <maximumf>, %104, %cst_33 [1] : vector<8x8xf32> to vector<8xf32>
    %106 = vector.shape_cast %105 : vector<8xf32> to vector<8x1xf32>
    %107 = vector.broadcast %106 : vector<8x1xf32> to vector<8x8xf32>
    %108 = arith.subf %104, %107 : vector<8x8xf32>
    %109 = math.exp %108 : vector<8x8xf32>
    %cst_34 = arith.constant dense<0.000000e+00> : vector<8xf32>
    %110 = vector.multi_reduction <add>, %109, %cst_34 [1] : vector<8x8xf32> to vector<8xf32>
    %111 = vector.shape_cast %110 : vector<8xf32> to vector<8x1xf32>
    %112 = tpu.reciprocal %111 {approx = true} : vector<8x1xf32> -> vector<8x1xf32>
    %113 = vector.broadcast %112 : vector<8x1xf32> to vector<8x8xf32>
    %114 = arith.mulf %109, %113 : vector<8x8xf32>
    %cst_35 = arith.constant dense<0.000000e+00> : vector<8x32xf32>
    %115 = tpu.matmul %114, %101, %cst_35 {dimension_numbers = #tpu.dot_dimension_numbers<[1], [0], [0], [1], [0, 0, 1, 1], [], []>} : vector<8x8xf32>, vector<8x32xf32>, vector<8x32xf32> -> vector<8x32xf32>
    %c8 = arith.constant 8 : index
    %c0_36 = arith.constant 0 : index
    %116 = vector.load %arg26[%c8, %c0_36] : memref<16x128xf32, #tpu.memory_space<vmem>>, vector<8x32xf32>
    tpu.vector_store %arg26[%c8, %c0_36], %115 {strides = array<i32>} : memref<16x128xf32, #tpu.memory_space<vmem>>, vector<8x32xf32>,
    %117 = vector.extract_strided_slice %93 {offsets = [0, 32], sizes = [8, 32], strides = [1, 1]} : vector<8x128xf32> to vector<8x32xf32>
    %118 = vector.extract_strided_slice %94 {offsets = [0, 32], sizes = [8, 32], strides = [1, 1]} : vector<8x128xf32> to vector<8x32xf32>
    %119 = vector.extract_strided_slice %95 {offsets = [0, 32], sizes = [8, 32], strides = [1, 1]} : vector<8x128xf32> to vector<8x32xf32>
    %120 = tpu.transpose %118, [1, 0] : vector<8x32xf32> -> vector<32x8xf32>
    %cst_37 = arith.constant dense<0.000000e+00> : vector<8x8xf32>
    %121 = tpu.matmul %117, %120, %cst_37 {dimension_numbers = #tpu.dot_dimension_numbers<[1], [0], [0], [1], [0, 0, 1, 1], [], []>} : vector<8x32xf32>, vector<32x8xf32>, vector<8x8xf32> -> vector<8x8xf32>
    %122 = arith.addf %121, %98 : vector<8x8xf32>
    %cst_38 = arith.constant dense<0xFF800000> : vector<8xf32>
    %123 = vector.multi_reduction <maximumf>, %122, %cst_38 [1] : vector<8x8xf32> to vector<8xf32>
    %124 = vector.shape_cast %123 : vector<8xf32> to vector<8x1xf32>
    %125 = vector.broadcast %124 : vector<8x1xf32> to vector<8x8xf32>
    %126 = arith.subf %122, %125 : vector<8x8xf32>
    %127 = math.exp %126 : vector<8x8xf32>
    %cst_39 = arith.constant dense<0.000000e+00> : vector<8xf32>
    %128 = vector.multi_reduction <add>, %127, %cst_39 [1] : vector<8x8xf32> to vector<8xf32>
    %129 = vector.shape_cast %128 : vector<8xf32> to vector<8x1xf32>
    %130 = tpu.reciprocal %129 {approx = true} : vector<8x1xf32> -> vector<8x1xf32>
    %131 = vector.broadcast %130 : vector<8x1xf32> to vector<8x8xf32>
    %132 = arith.mulf %127, %131 : vector<8x8xf32>
    %cst_40 = arith.constant dense<0.000000e+00> : vector<8x32xf32>
    %133 = tpu.matmul %132, %119, %cst_40 {dimension_numbers = #tpu.dot_dimension_numbers<[1], [0], [0], [1], [0, 0, 1, 1], [], []>} : vector<8x8xf32>, vector<8x32xf32>, vector<8x32xf32> -> vector<8x32xf32>
    %c8_41 = arith.constant 8 : index
    %c32_42 = arith.constant 32 : index
    %134 = vector.load %arg26[%c8_41, %c32_42] : memref<16x128xf32, #tpu.memory_space<vmem>>, vector<8x32xf32>
    tpu.vector_store %arg26[%c8_41, %c32_42], %133 {strides = array<i32>} : memref<16x128xf32, #tpu.memory_space<vmem>>, vector<8x32xf32>,
    %135 = vector.extract_strided_slice %93 {offsets = [0, 64], sizes = [8, 32], strides = [1, 1]} : vector<8x128xf32> to vector<8x32xf32>
    %136 = vector.extract_strided_slice %94 {offsets = [0, 64], sizes = [8, 32], strides = [1, 1]} : vector<8x128xf32> to vector<8x32xf32>
    %137 = vector.extract_strided_slice %95 {offsets = [0, 64], sizes = [8, 32], strides = [1, 1]} : vector<8x128xf32> to vector<8x32xf32>
    %138 = tpu.transpose %136, [1, 0] : vector<8x32xf32> -> vector<32x8xf32>
    %cst_43 = arith.constant dense<0.000000e+00> : vector<8x8xf32>
    %139 = tpu.matmul %135, %138, %cst_43 {dimension_numbers = #tpu.dot_dimension_numbers<[1], [0], [0], [1], [0, 0, 1, 1], [], []>} : vector<8x32xf32>, vector<32x8xf32>, vector<8x8xf32> -> vector<8x8xf32>
    %140 = arith.addf %139, %98 : vector<8x8xf32>
    %cst_44 = arith.constant dense<0xFF800000> : vector<8xf32>
    %141 = vector.multi_reduction <maximumf>, %140, %cst_44 [1] : vector<8x8xf32> to vector<8xf32>
    %142 = vector.shape_cast %141 : vector<8xf32> to vector<8x1xf32>
    %143 = vector.broadcast %142 : vector<8x1xf32> to vector<8x8xf32>
    %144 = arith.subf %140, %143 : vector<8x8xf32>
    %145 = math.exp %144 : vector<8x8xf32>
    %cst_45 = arith.constant dense<0.000000e+00> : vector<8xf32>
    %146 = vector.multi_reduction <add>, %145, %cst_45 [1] : vector<8x8xf32> to vector<8xf32>
    %147 = vector.shape_cast %146 : vector<8xf32> to vector<8x1xf32>
    %148 = tpu.reciprocal %147 {approx = true} : vector<8x1xf32> -> vector<8x1xf32>
    %149 = vector.broadcast %148 : vector<8x1xf32> to vector<8x8xf32>
    %150 = arith.mulf %145, %149 : vector<8x8xf32>
    %cst_46 = arith.constant dense<0.000000e+00> : vector<8x32xf32>
    %151 = tpu.matmul %150, %137, %cst_46 {dimension_numbers = #tpu.dot_dimension_numbers<[1], [0], [0], [1], [0, 0, 1, 1], [], []>} : vector<8x8xf32>, vector<8x32xf32>, vector<8x32xf32> -> vector<8x32xf32>
    %c8_47 = arith.constant 8 : index
    %c64_48 = arith.constant 64 : index
    %152 = vector.load %arg26[%c8_47, %c64_48] : memref<16x128xf32, #tpu.memory_space<vmem>>, vector<8x32xf32>
    tpu.vector_store %arg26[%c8_47, %c64_48], %151 {strides = array<i32>} : memref<16x128xf32, #tpu.memory_space<vmem>>, vector<8x32xf32>,
    %153 = vector.extract_strided_slice %93 {offsets = [0, 96], sizes = [8, 32], strides = [1, 1]} : vector<8x128xf32> to vector<8x32xf32>
    %154 = vector.extract_strided_slice %94 {offsets = [0, 96], sizes = [8, 32], strides = [1, 1]} : vector<8x128xf32> to vector<8x32xf32>
    %155 = vector.extract_strided_slice %95 {offsets = [0, 96], sizes = [8, 32], strides = [1, 1]} : vector<8x128xf32> to vector<8x32xf32>
    %156 = tpu.transpose %154, [1, 0] : vector<8x32xf32> -> vector<32x8xf32>
    %cst_49 = arith.constant dense<0.000000e+00> : vector<8x8xf32>
    %157 = tpu.matmul %153, %156, %cst_49 {dimension_numbers = #tpu.dot_dimension_numbers<[1], [0], [0], [1], [0, 0, 1, 1], [], []>} : vector<8x32xf32>, vector<32x8xf32>, vector<8x8xf32> -> vector<8x8xf32>
    %158 = arith.addf %157, %98 : vector<8x8xf32>
    %cst_50 = arith.constant dense<0xFF800000> : vector<8xf32>
    %159 = vector.multi_reduction <maximumf>, %158, %cst_50 [1] : vector<8x8xf32> to vector<8xf32>
    %160 = vector.shape_cast %159 : vector<8xf32> to vector<8x1xf32>
    %161 = vector.broadcast %160 : vector<8x1xf32> to vector<8x8xf32>
    %162 = arith.subf %158, %161 : vector<8x8xf32>
    %163 = math.exp %162 : vector<8x8xf32>
    %cst_51 = arith.constant dense<0.000000e+00> : vector<8xf32>
    %164 = vector.multi_reduction <add>, %163, %cst_51 [1] : vector<8x8xf32> to vector<8xf32>
    %165 = vector.shape_cast %164 : vector<8xf32> to vector<8x1xf32>
    %166 = tpu.reciprocal %165 {approx = true} : vector<8x1xf32> -> vector<8x1xf32>
    %167 = vector.broadcast %166 : vector<8x1xf32> to vector<8x8xf32>
    %168 = arith.mulf %163, %167 : vector<8x8xf32>
    %cst_52 = arith.constant dense<0.000000e+00> : vector<8x32xf32>
    %169 = tpu.matmul %168, %155, %cst_52 {dimension_numbers = #tpu.dot_dimension_numbers<[1], [0], [0], [1], [0, 0, 1, 1], [], []>} : vector<8x8xf32>, vector<8x32xf32>, vector<8x32xf32> -> vector<8x32xf32>
    %c8_53 = arith.constant 8 : index
    %c96_54 = arith.constant 96 : index
    %170 = vector.load %arg26[%c8_53, %c96_54] : memref<16x128xf32, #tpu.memory_space<vmem>>, vector<8x32xf32>
    tpu.vector_store %arg26[%c8_53, %c96_54], %169 {strides = array<i32>} : memref<16x128xf32, #tpu.memory_space<vmem>>, vector<8x32xf32>,
    %c0_55 = arith.constant 0 : index
    %c0_56 = arith.constant 0 : index
    %171 = vector.load %arg26[%c0_55, %c0_56] : memref<16x128xf32, #tpu.memory_space<vmem>>, vector<16x128xf32>
    %172 = arith.truncf %171 : vector<16x128xf32> to vector<16x128xbf16>
    %c0_57 = arith.constant 0 : index
    %c0_58 = arith.constant 0 : index
    %c0_59 = arith.constant 0 : index
    %173 = vector.load %arg10[%c0_57, %c0_58, %c0_59] : memref<1x128x128xbf16, #tpu.memory_space<vmem>>, vector<1x128x128xbf16>
    %174 = vector.shape_cast %173 : vector<1x128x128xbf16> to vector<128x128xbf16>
    %cst_60 = arith.constant dense<0.000000e+00> : vector<16x128xf32>
    %175 = tpu.matmul %172, %174, %cst_60 {dimension_numbers = #tpu.dot_dimension_numbers<[1], [0], [0], [1], [0, 0, 1, 1], [], []>} : vector<16x128xbf16>, vector<128x128xbf16>, vector<16x128xf32> -> vector<16x128xf32>
    %c0_61 = arith.constant 0 : index
    %c0_62 = arith.constant 0 : index
    %c0_63 = arith.constant 0 : index
    %176 = vector.load %arg11[%c0_61, %c0_62, %c0_63] : memref<1x1x128xf32, #tpu.memory_space<vmem>>, vector<1x1x128xf32>
    %177 = vector.shape_cast %176 : vector<1x1x128xf32> to vector<1x128xf32>
    %178 = vector.broadcast %177 : vector<1x128xf32> to vector<16x128xf32>
    %179 = arith.addf %175, %178 : vector<16x128xf32>
    %180 = arith.addf %3, %179 : vector<16x128xf32>
    %c0_64 = arith.constant 0 : index
    %c0_65 = arith.constant 0 : index
    %c0_66 = arith.constant 0 : index
    %181 = vector.load %arg12[%c0_64, %c0_65, %c0_66] : memref<1x1x128xf32, #tpu.memory_space<vmem>>, vector<1x1x128xf32>
    %182 = vector.shape_cast %181 : vector<1x1x128xf32> to vector<1x128xf32>
    %c0_67 = arith.constant 0 : index
    %c0_68 = arith.constant 0 : index
    %c0_69 = arith.constant 0 : index
    %183 = vector.load %arg13[%c0_67, %c0_68, %c0_69] : memref<1x1x128xf32, #tpu.memory_space<vmem>>, vector<1x1x128xf32>
    %184 = vector.shape_cast %183 : vector<1x1x128xf32> to vector<1x128xf32>
    %cst_70 = arith.constant dense<0.000000e+00> : vector<16xf32>
    %185 = vector.multi_reduction <add>, %180, %cst_70 [1] : vector<16x128xf32> to vector<16xf32>
    %186 = vector.shape_cast %185 : vector<16xf32> to vector<16x1xf32>
    %cst_71 = arith.constant 1.280000e+02 : f32
    %187 = vector.broadcast %cst_71 : f32 to vector<16x1xf32>
    %188 = arith.divf %186, %187 : vector<16x1xf32>
    %189 = vector.broadcast %188 : vector<16x1xf32> to vector<16x128xf32>
    %190 = arith.subf %180, %189 : vector<16x128xf32>
    %191 = arith.mulf %190, %190 : vector<16x128xf32>
    %cst_72 = arith.constant dense<0.000000e+00> : vector<16xf32>
    %192 = vector.multi_reduction <add>, %191, %cst_72 [1] : vector<16x128xf32> to vector<16xf32>
    %193 = vector.shape_cast %192 : vector<16xf32> to vector<16x1xf32>
    %cst_73 = arith.constant 1.280000e+02 : f32
    %194 = vector.broadcast %cst_73 : f32 to vector<16x1xf32>
    %195 = arith.divf %193, %194 : vector<16x1xf32>
    %196 = vector.broadcast %188 : vector<16x1xf32> to vector<16x128xf32>
    %197 = arith.subf %180, %196 : vector<16x128xf32>
    %cst_74 = arith.constant 9.99999996E-13 : f32
    %198 = vector.broadcast %cst_74 : f32 to vector<16x1xf32>
    %199 = arith.addf %195, %198 : vector<16x1xf32>
    %200 = math.rsqrt %199 : vector<16x1xf32>
    %201 = vector.broadcast %200 : vector<16x1xf32> to vector<16x128xf32>
    %202 = arith.mulf %197, %201 : vector<16x128xf32>
    %203 = vector.broadcast %182 : vector<1x128xf32> to vector<16x128xf32>
    %204 = arith.mulf %202, %203 : vector<16x128xf32>
    %205 = vector.broadcast %184 : vector<1x128xf32> to vector<16x128xf32>
    %206 = arith.addf %204, %205 : vector<16x128xf32>
    %207 = arith.truncf %206 : vector<16x128xf32> to vector<16x128xbf16>
    %c0_75 = arith.constant 0 : index
    %c0_76 = arith.constant 0 : index
    %c0_77 = arith.constant 0 : index
    %208 = vector.load %arg14[%c0_75, %c0_76, %c0_77] : memref<1x128x256xbf16, #tpu.memory_space<vmem>>, vector<1x128x256xbf16>
    %209 = vector.shape_cast %208 : vector<1x128x256xbf16> to vector<128x256xbf16>
    %cst_78 = arith.constant dense<0.000000e+00> : vector<16x256xf32>
    %210 = tpu.matmul %207, %209, %cst_78 {dimension_numbers = #tpu.dot_dimension_numbers<[1], [0], [0], [1], [0, 0, 1, 1], [], []>} : vector<16x128xbf16>, vector<128x256xbf16>, vector<16x256xf32> -> vector<16x256xf32>
    %c0_79 = arith.constant 0 : index
    %c0_80 = arith.constant 0 : index
    %c0_81 = arith.constant 0 : index
    %211 = vector.load %arg15[%c0_79, %c0_80, %c0_81] : memref<1x1x256xf32, #tpu.memory_space<vmem>>, vector<1x1x256xf32>
    %212 = vector.shape_cast %211 : vector<1x1x256xf32> to vector<1x256xf32>
    %213 = vector.broadcast %212 : vector<1x256xf32> to vector<16x256xf32>
    %214 = arith.addf %210, %213 : vector<16x256xf32>
    %215 = arith.mulf %214, %214 : vector<16x256xf32>
    %216 = arith.mulf %214, %215 : vector<16x256xf32>
    %cst_82 = arith.constant 4.471500e-02 : f32
    %217 = vector.broadcast %cst_82 : f32 to vector<16x256xf32>
    %218 = arith.mulf %217, %216 : vector<16x256xf32>
    %219 = arith.addf %214, %218 : vector<16x256xf32>
    %cst_83 = arith.constant 0.797884583 : f32
    %220 = vector.broadcast %cst_83 : f32 to vector<16x256xf32>
    %221 = arith.mulf %220, %219 : vector<16x256xf32>
    %222 = math.tanh %221 : vector<16x256xf32>
    %cst_84 = arith.constant 1.000000e+00 : f32
    %223 = vector.broadcast %cst_84 : f32 to vector<16x256xf32>
    %224 = arith.addf %223, %222 : vector<16x256xf32>
    %cst_85 = arith.constant 5.000000e-01 : f32
    %225 = vector.broadcast %cst_85 : f32 to vector<16x256xf32>
    %226 = arith.mulf %225, %224 : vector<16x256xf32>
    %227 = arith.mulf %214, %226 : vector<16x256xf32>
    %228 = arith.truncf %227 : vector<16x256xf32> to vector<16x256xbf16>
    %c0_86 = arith.constant 0 : index
    %c0_87 = arith.constant 0 : index
    %c0_88 = arith.constant 0 : index
    %229 = vector.load %arg16[%c0_86, %c0_87, %c0_88] : memref<1x256x128xbf16, #tpu.memory_space<vmem>>, vector<1x256x128xbf16>
    %230 = vector.shape_cast %229 : vector<1x256x128xbf16> to vector<256x128xbf16>
    %cst_89 = arith.constant dense<0.000000e+00> : vector<16x128xf32>
    %231 = tpu.matmul %228, %230, %cst_89 {dimension_numbers = #tpu.dot_dimension_numbers<[1], [0], [0], [1], [0, 0, 1, 1], [], []>} : vector<16x256xbf16>, vector<256x128xbf16>, vector<16x128xf32> -> vector<16x128xf32>
    %c0_90 = arith.constant 0 : index
    %c0_91 = arith.constant 0 : index
    %c0_92 = arith.constant 0 : index
    %232 = vector.load %arg17[%c0_90, %c0_91, %c0_92] : memref<1x1x128xf32, #tpu.memory_space<vmem>>, vector<1x1x128xf32>
    %233 = vector.shape_cast %232 : vector<1x1x128xf32> to vector<1x128xf32>
    %234 = vector.broadcast %233 : vector<1x128xf32> to vector<16x128xf32>
    %235 = arith.addf %231, %234 : vector<16x128xf32>
    %236 = arith.addf %206, %235 : vector<16x128xf32>
    %c0_93 = arith.constant 0 : index
    %c0_94 = arith.constant 0 : index
    %c0_95 = arith.constant 0 : index
    %237 = vector.load %arg18[%c0_93, %c0_94, %c0_95] : memref<1x1x128xf32, #tpu.memory_space<vmem>>, vector<1x1x128xf32>
    %238 = vector.shape_cast %237 : vector<1x1x128xf32> to vector<1x128xf32>
    %c0_96 = arith.constant 0 : index
    %c0_97 = arith.constant 0 : index
    %c0_98 = arith.constant 0 : index
    %239 = vector.load %arg19[%c0_96, %c0_97, %c0_98] : memref<1x1x128xf32, #tpu.memory_space<vmem>>, vector<1x1x128xf32>
    %240 = vector.shape_cast %239 : vector<1x1x128xf32> to vector<1x128xf32>
    %cst_99 = arith.constant dense<0.000000e+00> : vector<16xf32>
    %241 = vector.multi_reduction <add>, %236, %cst_99 [1] : vector<16x128xf32> to vector<16xf32>
    %242 = vector.shape_cast %241 : vector<16xf32> to vector<16x1xf32>
    %cst_100 = arith.constant 1.280000e+02 : f32
    %243 = vector.broadcast %cst_100 : f32 to vector<16x1xf32>
    %244 = arith.divf %242, %243 : vector<16x1xf32>
    %245 = vector.broadcast %244 : vector<16x1xf32> to vector<16x128xf32>
    %246 = arith.subf %236, %245 : vector<16x128xf32>
    %247 = arith.mulf %246, %246 : vector<16x128xf32>
    %cst_101 = arith.constant dense<0.000000e+00> : vector<16xf32>
    %248 = vector.multi_reduction <add>, %247, %cst_101 [1] : vector<16x128xf32> to vector<16xf32>
    %249 = vector.shape_cast %248 : vector<16xf32> to vector<16x1xf32>
    %cst_102 = arith.constant 1.280000e+02 : f32
    %250 = vector.broadcast %cst_102 : f32 to vector<16x1xf32>
    %251 = arith.divf %249, %250 : vector<16x1xf32>
    %252 = vector.broadcast %244 : vector<16x1xf32> to vector<16x128xf32>
    %253 = arith.subf %236, %252 : vector<16x128xf32>
    %cst_103 = arith.constant 9.99999996E-13 : f32
    %254 = vector.broadcast %cst_103 : f32 to vector<16x1xf32>
    %255 = arith.addf %251, %254 : vector<16x1xf32>
    %256 = math.rsqrt %255 : vector<16x1xf32>
    %257 = vector.broadcast %256 : vector<16x1xf32> to vector<16x128xf32>
    %258 = arith.mulf %253, %257 : vector<16x128xf32>
    %259 = vector.broadcast %238 : vector<1x128xf32> to vector<16x128xf32>
    %260 = arith.mulf %258, %259 : vector<16x128xf32>
    %261 = vector.broadcast %240 : vector<1x128xf32> to vector<16x128xf32>
    %262 = arith.addf %260, %261 : vector<16x128xf32>
    %c0_104 = arith.constant 0 : index
    %c0_105 = arith.constant 0 : index
    %263 = vector.load %arg25[%c0_104, %c0_105] : memref<16x128xf32, #tpu.memory_space<vmem>>, vector<16x128xf32>
    tpu.vector_store %arg25[%c0_104, %c0_105], %262 {strides = array<i32>} : memref<16x128xf32, #tpu.memory_space<vmem>>, vector<16x128xf32>,
    %c1_i32 = arith.constant 1 : i32
    %264 = arith.cmpi eq, %arg0, %c1_i32 : i32
    %265 = arith.extui %264 : i1 to i32
    %c0_i32_106 = arith.constant 0 : i32
    %266 = arith.cmpi ne, %265, %c0_i32_106 : i32
    scf.if %266 {
      %267 = vector.extract_strided_slice %262 {offsets = [0, 0], sizes = [1, 128], strides = [1, 1]} : vector<16x128xf32> to vector<1x128xf32>
      %268 = vector.extract_strided_slice %262 {offsets = [8, 0], sizes = [1, 128], strides = [1, 1]} : vector<16x128xf32> to vector<1x128xf32>
      %269 = tpu.concatenate %267, %268 in 0 : vector<1x128xf32>, vector<1x128xf32> -> vector<2x128xf32>
      %270 = arith.truncf %269 : vector<2x128xf32> to vector<2x128xbf16>
      %c0_107 = arith.constant 0 : index
      %c0_108 = arith.constant 0 : index
      %271 = vector.load %arg20[%c0_107, %c0_108] : memref<128x128xbf16, #tpu.memory_space<vmem>>, vector<128x128xbf16>
      %cst_109 = arith.constant dense<0.000000e+00> : vector<2x128xf32>
      %272 = tpu.matmul %270, %271, %cst_109 {dimension_numbers = #tpu.dot_dimension_numbers<[1], [0], [0], [1], [0, 0, 1, 1], [], []>} : vector<2x128xbf16>, vector<128x128xbf16>, vector<2x128xf32> -> vector<2x128xf32>
      %c0_110 = arith.constant 0 : index
      %c0_111 = arith.constant 0 : index
      %273 = vector.load %arg21[%c0_110, %c0_111] : memref<1x128xf32, #tpu.memory_space<vmem>>, vector<1x128xf32>
      %274 = vector.broadcast %273 : vector<1x128xf32> to vector<2x128xf32>
      %275 = arith.addf %272, %274 : vector<2x128xf32>
      %cst_112 = arith.constant 0.000000e+00 : f32
      %276 = vector.broadcast %cst_112 : f32 to vector<2x128xf32>
      %277 = arith.maximumf %275, %276 : vector<2x128xf32>
      %278 = arith.truncf %277 : vector<2x128xf32> to vector<2x128xbf16>
      %c0_113 = arith.constant 0 : index
      %c0_114 = arith.constant 0 : index
      %279 = vector.load %arg22[%c0_113, %c0_114] : memref<128x128xbf16, #tpu.memory_space<vmem>>, vector<128x128xbf16>
      %cst_115 = arith.constant dense<0.000000e+00> : vector<2x128xf32>
      %280 = tpu.matmul %278, %279, %cst_115 {dimension_numbers = #tpu.dot_dimension_numbers<[1], [0], [0], [1], [0, 0, 1, 1], [], []>} : vector<2x128xbf16>, vector<128x128xbf16>, vector<2x128xf32> -> vector<2x128xf32>
      %c0_116 = arith.constant 0 : index
      %c0_117 = arith.constant 0 : index
      %281 = vector.load %arg23[%c0_116, %c0_117] : memref<1x128xf32, #tpu.memory_space<vmem>>, vector<1x128xf32>
      %282 = vector.broadcast %281 : vector<1x128xf32> to vector<2x128xf32>
      %283 = arith.addf %280, %282 : vector<2x128xf32>
      %c0_118 = arith.constant 0 : index
      %c0_119 = arith.constant 0 : index
      %284 = vector.load %arg24[%c0_118, %c0_119] : memref<2x128xf32, #tpu.memory_space<vmem>>, vector<2x128xf32>
      tpu.vector_store %arg24[%c0_118, %c0_119], %283 {strides = array<i32>} : memref<2x128xf32, #tpu.memory_space<vmem>>, vector<2x128xf32>,
    } else {
    }
    return
  }
  func.func @transform_0(%arg0: i32, %arg1: memref<16xi32, #tpu.memory_space<smem>>) -> (i32, i32) {
    %c0_i32 = arith.constant 0 : i32
    %c0_i32_0 = arith.constant 0 : i32
    %c0_i32_1 = arith.constant 0 : i32
    return %c0_i32, %c0_i32_0 : i32, i32
  }
  func.func @transform_1(%arg0: i32, %arg1: memref<16xi32, #tpu.memory_space<smem>>) -> (i32, i32) {
    %c0_i32 = arith.constant 0 : i32
    %c0_i32_0 = arith.constant 0 : i32
    %c0_i32_1 = arith.constant 0 : i32
    return %c0_i32, %c0_i32_0 : i32, i32
  }
  func.func @transform_2(%arg0: i32, %arg1: memref<16xi32, #tpu.memory_space<smem>>) -> (i32, i32) {
    %c0_i32 = arith.constant 0 : i32
    %c0_i32_0 = arith.constant 0 : i32
    %c0_i32_1 = arith.constant 0 : i32
    return %c0_i32, %c0_i32_0 : i32, i32
  }
  func.func @transform_3(%arg0: i32, %arg1: memref<16xi32, #tpu.memory_space<smem>>) -> (i32, i32) {
    %c0_i32 = arith.constant 0 : i32
    %c0_i32_0 = arith.constant 0 : i32
    %c0_i32_1 = arith.constant 0 : i32
    return %c0_i32, %c0_i32_0 : i32, i32
  }
  func.func @transform_4(%arg0: i32, %arg1: memref<16xi32, #tpu.memory_space<smem>>) -> (i32, i32) {
    %c0_i32 = arith.constant 0 : i32
    %c0_i32_0 = arith.constant 0 : i32
    %c0_i32_1 = arith.constant 0 : i32
    return %c0_i32, %c0_i32_0 : i32, i32
  }
  func.func @transform_5(%arg0: i32, %arg1: memref<16xi32, #tpu.memory_space<smem>>) -> (i32, i32) {
    %c0_i32 = arith.constant 0 : i32
    %c0_i32_0 = arith.constant 0 : i32
    %c0_i32_1 = arith.constant 0 : i32
    return %c0_i32, %c0_i32_0 : i32, i32
  }
  func.func @transform_6(%arg0: i32, %arg1: memref<16xi32, #tpu.memory_space<smem>>) -> (i32, i32, i32) {
    %c0_i32 = arith.constant 0 : i32
    %c0_i32_0 = arith.constant 0 : i32
    %c0_i32_1 = arith.constant 0 : i32
    return %arg0, %c0_i32, %c0_i32_0 : i32, i32, i32
  }
  func.func @transform_7(%arg0: i32, %arg1: memref<16xi32, #tpu.memory_space<smem>>) -> (i32, i32, i32) {
    %c0_i32 = arith.constant 0 : i32
    %c0_i32_0 = arith.constant 0 : i32
    %c0_i32_1 = arith.constant 0 : i32
    return %arg0, %c0_i32, %c0_i32_0 : i32, i32, i32
  }
  func.func @transform_8(%arg0: i32, %arg1: memref<16xi32, #tpu.memory_space<smem>>) -> (i32, i32, i32) {
    %c0_i32 = arith.constant 0 : i32
    %c0_i32_0 = arith.constant 0 : i32
    %c0_i32_1 = arith.constant 0 : i32
    return %arg0, %c0_i32, %c0_i32_0 : i32, i32, i32
  }
  func.func @transform_9(%arg0: i32, %arg1: memref<16xi32, #tpu.memory_space<smem>>) -> (i32, i32, i32) {
    %c0_i32 = arith.constant 0 : i32
    %c0_i32_0 = arith.constant 0 : i32
    %c0_i32_1 = arith.constant 0 : i32
    return %arg0, %c0_i32, %c0_i32_0 : i32, i32, i32
  }
  func.func @transform_10(%arg0: i32, %arg1: memref<16xi32, #tpu.memory_space<smem>>) -> (i32, i32, i32) {
    %c0_i32 = arith.constant 0 : i32
    %c0_i32_0 = arith.constant 0 : i32
    %c0_i32_1 = arith.constant 0 : i32
    return %arg0, %c0_i32, %c0_i32_0 : i32, i32, i32
  }
  func.func @transform_11(%arg0: i32, %arg1: memref<16xi32, #tpu.memory_space<smem>>) -> (i32, i32, i32) {
    %c0_i32 = arith.constant 0 : i32
    %c0_i32_0 = arith.constant 0 : i32
    %c0_i32_1 = arith.constant 0 : i32
    return %arg0, %c0_i32, %c0_i32_0 : i32, i32, i32
  }
  func.func @transform_12(%arg0: i32, %arg1: memref<16xi32, #tpu.memory_space<smem>>) -> (i32, i32, i32) {
    %c0_i32 = arith.constant 0 : i32
    %c0_i32_0 = arith.constant 0 : i32
    %c0_i32_1 = arith.constant 0 : i32
    return %arg0, %c0_i32, %c0_i32_0 : i32, i32, i32
  }
  func.func @transform_13(%arg0: i32, %arg1: memref<16xi32, #tpu.memory_space<smem>>) -> (i32, i32, i32) {
    %c0_i32 = arith.constant 0 : i32
    %c0_i32_0 = arith.constant 0 : i32
    %c0_i32_1 = arith.constant 0 : i32
    return %arg0, %c0_i32, %c0_i32_0 : i32, i32, i32
  }
  func.func @transform_14(%arg0: i32, %arg1: memref<16xi32, #tpu.memory_space<smem>>) -> (i32, i32, i32) {
    %c0_i32 = arith.constant 0 : i32
    %c0_i32_0 = arith.constant 0 : i32
    %c0_i32_1 = arith.constant 0 : i32
    return %arg0, %c0_i32, %c0_i32_0 : i32, i32, i32
  }
  func.func @transform_15(%arg0: i32, %arg1: memref<16xi32, #tpu.memory_space<smem>>) -> (i32, i32, i32) {
    %c0_i32 = arith.constant 0 : i32
    %c0_i32_0 = arith.constant 0 : i32
    %c0_i32_1 = arith.constant 0 : i32
    return %arg0, %c0_i32, %c0_i32_0 : i32, i32, i32
  }
  func.func @transform_16(%arg0: i32, %arg1: memref<16xi32, #tpu.memory_space<smem>>) -> (i32, i32, i32) {
    %c0_i32 = arith.constant 0 : i32
    %c0_i32_0 = arith.constant 0 : i32
    %c0_i32_1 = arith.constant 0 : i32
    return %arg0, %c0_i32, %c0_i32_0 : i32, i32, i32
  }
  func.func @transform_17(%arg0: i32, %arg1: memref<16xi32, #tpu.memory_space<smem>>) -> (i32, i32, i32) {
    %c0_i32 = arith.constant 0 : i32
    %c0_i32_0 = arith.constant 0 : i32
    %c0_i32_1 = arith.constant 0 : i32
    return %arg0, %c0_i32, %c0_i32_0 : i32, i32, i32
  }
  func.func @transform_18(%arg0: i32, %arg1: memref<16xi32, #tpu.memory_space<smem>>) -> (i32, i32) {
    %c0_i32 = arith.constant 0 : i32
    %c0_i32_0 = arith.constant 0 : i32
    %c0_i32_1 = arith.constant 0 : i32
    return %c0_i32, %c0_i32_0 : i32, i32
  }
  func.func @transform_19(%arg0: i32, %arg1: memref<16xi32, #tpu.memory_space<smem>>) -> (i32, i32) {
    %c0_i32 = arith.constant 0 : i32
    %c0_i32_0 = arith.constant 0 : i32
    %c0_i32_1 = arith.constant 0 : i32
    return %c0_i32, %c0_i32_0 : i32, i32
  }
  func.func @transform_20(%arg0: i32, %arg1: memref<16xi32, #tpu.memory_space<smem>>) -> (i32, i32) {
    %c0_i32 = arith.constant 0 : i32
    %c0_i32_0 = arith.constant 0 : i32
    %c0_i32_1 = arith.constant 0 : i32
    return %c0_i32, %c0_i32_0 : i32, i32
  }
  func.func @transform_21(%arg0: i32, %arg1: memref<16xi32, #tpu.memory_space<smem>>) -> (i32, i32) {
    %c0_i32 = arith.constant 0 : i32
    %c0_i32_0 = arith.constant 0 : i32
    %c0_i32_1 = arith.constant 0 : i32
    return %c0_i32, %c0_i32_0 : i32, i32
  }
  func.func @transform_22(%arg0: i32, %arg1: memref<16xi32, #tpu.memory_space<smem>>) -> (i32, i32) {
    %c0_i32 = arith.constant 0 : i32
    %c0_i32_0 = arith.constant 0 : i32
    %c0_i32_1 = arith.constant 0 : i32
    return %c0_i32, %c0_i32_0 : i32, i32
  }
}

</mosaic_0001>

<bundles_post_ra>
// kernel: bert_classifier_forward.1
= control target key start
LH: loop header
LB: loop body
LE: loop exit
PB: predicated region body
PF: predicated region fallthrough
CT: control target
= control target key end

     0   :  { %s5824_s0 = inlined_call_operand.vmem [shape: s32[16], index: 0, kind: input, shape index: {}]   ;;  %s5825_s1 = inlined_call_operand.vmem [shape: f32[2,8], index: 1, kind: input, shape index: {}]   ;;  %s5826_s2 = inlined_call_operand.vmem [shape: f32[64,128], index: 2, kind: input, shape index: {}]   ;;  %s5827_s3 = inlined_call_operand.hbm [shape: f32[32,128], index: 3, kind: input, shape index: {}]   ;;  %s5828_s4 = inlined_call_operand.vmem [shape: f32[1,128], index: 4, kind: input, shape index: {}]   ;;  %s5829_s5 = inlined_call_operand.vmem [shape: f32[1,128], index: 5, kind: input, shape index: {}]   ;;  %s5830_s6 = inlined_call_operand.hbm [shape: f32[1,128], index: 6, kind: input, shape index: {}]   ;;  %s5831_s7 = inlined_call_operand.hbm [shape: bf16[2,128,384], index: 7, kind: input, shape index: {}]   ;;  %s5832_s8 = inlined_call_operand.vmem [shape: f32[2,1,384], index: 8, kind: input, shape index: {}]   ;;  %s5833_s9 = inlined_call_operand.hbm [shape: bf16[2,128,128], index: 9, kind: input, shape index: {}]   ;;  %s5834_s10 = inlined_call_operand.vmem [shape: f32[2,1,128], index: 10, kind: input, shape index: {}]   ;;  %s5835_s11 = inlined_call_operand.vmem [shape: f32[2,1,128], index: 11, kind: input, shape index: {}]   ;;  %s5836_s12 = inlined_call_operand.vmem [shape: f32[2,1,128], index: 12, kind: input, shape index: {}]   ;;  %s5837_s13 = inlined_call_operand.hbm [shape: bf16[2,128,256], index: 13, kind: input, shape index: {}]   ;;  %s5838_s14 = inlined_call_operand.vmem [shape: f32[2,1,256], index: 14, kind: input, shape index: {}]   ;;  %s5839_s15 = inlined_call_operand.hbm [shape: bf16[2,256,128], index: 15, kind: input, shape index: {}]   ;;  %s5840_s16 = inlined_call_operand.vmem [shape: f32[2,1,128], index: 16, kind: input, shape index: {}]   ;;  %s5841_s17 = inlined_call_operand.vmem [shape: f32[2,1,128], index: 17, kind: input, shape index: {}]   ;;  %s5842_s18 = inlined_call_operand.vmem [shape: f32[2,1,128], index: 18, kind: input, shape index: {}]   ;;  %s5843_s19 = inlined_call_operand.hbm [shape: bf16[128,128], index: 19, kind: input, shape index: {}]   ;;  %s5844_s20 = inlined_call_operand.hbm [shape: f32[1,128], index: 20, kind: input, shape index: {}]   ;;  %s5845_s21 = inlined_call_operand.hbm [shape: bf16[128,128], index: 21, kind: input, shape index: {}]   ;;  %s5846_s22 = inlined_call_operand.hbm [shape: f32[1,128], index: 22, kind: input, shape index: {}]   ;;  %s5847_s23 = inlined_call_operand.hbm [shape: f32[2,128], index: 23, kind: output, shape index: {}]  }
   0x1   :  { %5882 = sst [smem:[#allocation34_spill]] %s5824_s0 }
   0x2   :  { %5883 = sst [smem:[#allocation35_spill]] %s5825_s1  ;;  %s5904_s24 = sld [smem:[#allocation34_spill]] }
   0x3   :  { %5884 = sst [smem:[#allocation36_spill]] %s5826_s2 }
   0x4   :  { %5885 = sst [smem:[#allocation37_spill]] %s5827_s3 }
   0x5   :  { %5886 = sst [smem:[#allocation38_spill]] %s5828_s4 }
   0x6   :  { %5887 = sst [smem:[#allocation39_spill]] %s5829_s5 }
   0x7   :  { %5888 = sst [smem:[#allocation40_spill]] %s5830_s6 }
   0x8   :  { %5889 = sst [smem:[#allocation41_spill]] %s5831_s7 }
   0x9   :  { %5890 = sst [smem:[#allocation42_spill]] %s5832_s8 }
   0xa   :  { %5891 = sst [smem:[#allocation43_spill]] %s5833_s9 }
   0xb   :  { %5892 = sst [smem:[#allocation44_spill]] %s5834_s10 }
   0xc   :  { %5893 = sst [smem:[#allocation45_spill]] %s5835_s11 }
   0xd   :  { %5894 = sst [smem:[#allocation46_spill]] %s5836_s12 }
   0xe   :  { %5895 = sst [smem:[#allocation47_spill]] %s5837_s13 }
   0xf   :  { %5896 = sst [smem:[#allocation48_spill]] %s5838_s14 }
  0x10   :  { %5897 = sst [smem:[#allocation49_spill]] %s5839_s15 }
  0x11   :  { %5898 = sst [smem:[#allocation50_spill]] %s5840_s16 }
  0x12   :  { %5899 = sst [smem:[#allocation51_spill]] %s5841_s17  ;;  %s28_s17 = sshll.u32 %s5904_s24, 4  ;;  %s29_s17 = int_to_ptr.vmem [resolvable:$true] %s28_s17 }
  0x13   :  { %5900 = sst [smem:[#allocation52_spill]] %s5842_s18  ;;  %s4474_s25 = scalar_lea.vmem %s29_s17, 16 }
  0x14   :  { %5901 = sst [smem:[#allocation53_spill]] %s5843_s19  ;;  %p4475_p0 = scmp.ne.s32.totalorder %s29_s17, %s4474_s25 }
  0x15   :  { %5902 = sst [smem:[#allocation54_spill]] %s5844_s20  ;;  %p4479_p1 = scmp.lt.s32.totalorder %s29_s17, %s29_s17 }
  0x16   :  { %5903 = sst [smem:[#allocation55_spill]] %s5847_s23  ;;  %p4480_p2 = scmp.lt.s32.totalorder %s4474_s25, %s4474_s25 }
  0x18   :  { %p4481_p3 = por %p4480_p2, %p4479_p1 }
  0x1a   :  { %p4482_p4 = pnand %p4481_p3, %p4475_p0 }
  0x1c   :  { %4485 = shalt.err (!%p4482_p4)  }
  0x1d   :  { %s4870_s5 = smov [#allocation5]  }
  0x1e   :  { %31 = dma.vmem_to_smem %s29_s17, 16, %s4870_s5, [#allocation4] }
  0x1f   :  { %4820 = dma.done.wait [#allocation4], 16 }
  0x20   :  { %4821 = vsyncadd [#allocation4], 4294967280 }
  0x21   :  { %33 = sfence }
  0x22   :  { %34 = vsyncpa [#allocation7], 0 }
  0x23   :  { %35 = vsyncpa [#allocation10], 0 }
  0x24   :  { %36 = vsyncpa [#allocation17], 0 }
  0x25   :  { %37 = vsyncpa [#allocation20], 0 }
  0x26   :  { %38 = vsyncpa [#allocation8], 0  ;;  %s5019_s1 = smov 0   ;;  %s5021_s26 = smov 0  }
  0x27   :  { %s5023_s2 = smov 0   ;;  %s5025_s6 = smov 0  }
  0x28 LB: > { %5905 = sst [smem:[#allocation30_spill]] %s4860_s2  ;;  %s4871_s17 = smov [#allocation6]   ;;  %s4864_s6 = sphi %s5025_s6, %s5972_s6   ;;  %s4860_s2 = sphi %s5023_s2, %s5974_s2   ;;  %s4856_s26 = sphi %s5021_s26, %s5976_s26   ;;  %s4852_s1 = sphi %s5019_s1, %s5975_s1  }
  0x29   : > { %s610_s27 = sshll.u32 %s4871_s17, 4  ;;  %s5040_s7 = sadd.s32 4294967295, %s4864_s6   ;;  %s611_s27 = int_to_ptr.vmem [resolvable:$true] %s610_s27 }
  0x2a   : > { %p3770_p5 = scmp.ge.s32.totalorder %s4864_s6, 1  ;;  %p5853_p6 = scmp.eq.s32.totalorder %s5040_s7, 0 }
  0x2b   : > { %p592_p7 = scmp.lt.s32.totalorder %s4864_s6, 3  ;;  %s5059_s3 = sadd.s32 1, %s4864_s6  }
  0x2c   : > { %5908 = sst [smem:[#allocation31_spill]] %s5059_s3  ;;  %s5909_s30 = sld [smem:[#allocation37_spill]] }
  0x2d   : > { %p5046_p9 = pnand %p3770_p5, %p592_p7 }
  0x2f   : > { %s5906_s28 = scalar_select %p5046_p9, 1, 0 }
  0x30   : > { %p4217_p10 = pneg %p5046_p9 }
  0x32   : > { %p5054_p11 = pnand %p4217_p10, %p5853_p6  ;;  %s4486_s24 = scalar_lea.hbm %s5909_s30, 512 }
  0x33   : > { %p4487_p12 = scmp.ne.s32.totalorder %s5909_s30, %s4486_s24  ;;  %p4493_p2 = scmp.lt.u32.totalorder %s4486_s24, %s5909_s30 }
  0x34   : > { %s5907_s29 = scalar_select %p5054_p11, 1, 0 }
  0x35   : > { %p5069_p13 = pneg %p5054_p11 }
  0x37   : > { %s5910_s17 = scalar_select %p5069_p13, 1, 0 }
  0x38   : > { %p4489_p0 = pnand %p5069_p13, %p4487_p12 }
  0x3a   : > { %p4490_p1 = pneg %p4489_p0 }
  0x3c   : > { %p4495_p3 = pnand %p4493_p2, %p4490_p1 }
  0x3e   : > { %4498 = shalt.err (!%p4495_p3)
}
  0x3f   : > { %s4499_s0 = scalar_lea.vmem %s611_s27, 512  ;;  %p4507_p10 = scmp.lt.s32.totalorder %s611_s27, %s611_s27 }
  0x40   : > { %p4500_p4 = scmp.ne.s32.totalorder %s611_s27, %s4499_s0  ;;  %p4508_p8 = scmp.lt.s32.totalorder %s4499_s0, %s4499_s0 }
  0x42   : > { %p4502_p5 = pnand %p4500_p4, %p5069_p13  ;;  %p4509_p6 = por %p4508_p8, %p4507_p10 }
  0x44   : > { %p4503_p7 = pneg %p4502_p5 }
  0x46   : > { %p4510_p9 = pnand %p4509_p6, %p4503_p7 }
  0x48   : > { %4513 = shalt.err (!%p4510_p9)
}
  0x49   : > { %s5855_s4 = smov 128   ;;  %s5856_s18 = smov 8  }
  0x4a   : > { %4220 = dma.hbm_to_vmem [thread:$0]  (!%p5054_p11), %s5909_s30, 512, %s611_s27, [#allocation7], %s5855_s4, %s5855_s4, %s5856_s18  }
  0x4b   : > { %s174_s25 = ssub.s32 %s4864_s6, %s5059_s3  ;;  %s177_s5 = sadd.s32 1, %s4860_s2 }
  0x4c   : > { %p175_p6 = scmp.eq.s32.totalorder %s174_s25, 0  ;;  %p184_p8 = scmp.ne.s32.totalorder %s4860_s2, %s4856_s26 }
  0x4d   : > { %p185_p9 = scmp.eq.s32.totalorder %s4864_s6, 0  ;;  %p190_p12 = scmp.ne.s32.totalorder %s4856_s26, %s4852_s1 }
  0x4e   : > { %s5097_s0 = scalar_select %p175_p6, %s4860_s2, %s177_s5  }
  0x4f   : > { %p186_p0 = por %p185_p9, %p184_p8  ;;  %p5912_p1 = scmp.eq.s32.totalorder %s5040_s7, 0 }
  0x50   : > { %5911 = sst [smem:[#allocation32_spill]] %s5097_s0  ;;  %p4255_p3 = scmp.lt.s32.totalorder %s4864_s6, 2 }
  0x51   : > { %p5101_p2 = por %p5912_p1, %p190_p12  ;;  %s689_s14 = sand.u32 1, %s4864_s6  }
  0x52   : > { %s5108_s8 = sand.u32 1, %s4860_s2   ;;  %p5111_p4 = pnand %p4255_p3, %p186_p0 }
  0x53   : > { %s5913_s16 = scalar_select %p5101_p2, 1, 0 }
  0x54   : > { %s4177_s27 = smul.u32 192, %s5108_s8  ;;  %s5916_s5 = sld [smem:[#allocation41_spill]] }
  0x55   : > { %5914 = sst [smem:[#allocation33_spill]] %s5913_s16  ;;  %s4178_s1 = smul.u32 3072, %s4864_s6 }
  0x56   : > { %s5915_s23 = scalar_select %p5111_p4, 1, 0 }
  0x57   : > { %s693_s18 = scalar_lea.vmem [#allocation11], %s4177_s27  ;;  %s5123_s0 = scalar_lea.sflag [#allocation7], %s689_s14 }
  0x58   : > { %s700_s30 = sshll.u32 %s693_s18, 4  ;;  %p5129_p7 = pneg %p5111_p4  ;;  %s5121_s30 = int_to_ptr.vmem [resolvable:$true] %s700_s30 }
  0x5a   : > { %s5119_s4 = scalar_lea.hbm %s5916_s5, %s4178_s1  ;;  %s4519_s27 = scalar_lea.hbm %s5916_s5, 6144 }
  0x5b   : > { %s4514_s2 = scalar_lea.hbm %s5119_s4, 3072  ;;  %p4520_p8 = scmp.lt.u32.totalorder %s5119_s4, %s5916_s5 }
  0x5c   : > { %p4515_p5 = scmp.ne.s32.totalorder %s5119_s4, %s4514_s2  ;;  %p4521_p9 = scmp.lt.u32.totalorder %s4519_s27, %s4514_s2 }
  0x5d   : > { %s5917_s3 = scalar_select %p5129_p7, 1, 0 }
  0x5e   : > { %p4517_p10 = pnand %p5129_p7, %p4515_p5  ;;  %p4522_p12 = por %p4521_p9, %p4520_p8 }
  0x5f   : > { %p4523_p0 = scmp.lt.u32.totalorder %s4514_s2, %s5119_s4 }
  0x60   : > { %p4518_p6 = pneg %p4517_p10 }
  0x61   : > { %p4524_p1 = por %p4523_p0, %p4522_p12 }
  0x63   : > { %p4525_p3 = pnand %p4524_p1, %p4518_p6 }
  0x65   : > { %4528 = shalt.err (!%p4525_p3)
}
  0x66   : > { %s4529_s14 = scalar_lea.vmem %s5121_s30, 3072  ;;  %s4874_s1 = smov [#allocation11]  }
  0x67   : > { %p4530_p5 = scmp.ne.s32.totalorder %s5121_s30, %s4529_s14  ;;  %s4534_s24 = sshll.u32 %s4874_s1, 4  ;;  %s4535_s24 = int_to_ptr.vmem [resolvable:$false] %s4534_s24 }
  0x68   : > { %s4536_s18 = scalar_lea.vmem %s4535_s24, 6144  ;;  %p4537_p11 = scmp.lt.s32.totalorder %s5121_s30, %s4535_s24 }
  0x69   : > { %p4532_p10 = pnand %p4530_p5, %p5129_p7  ;;  %p4538_p13 = scmp.lt.s32.totalorder %s4536_s18, %s4529_s14 }
  0x6b   : > { %p4533_p2 = pneg %p4532_p10  ;;  %p4539_p8 = por %p4538_p13, %p4537_p11 }
  0x6d   : > { %p4540_p9 = pnand %p4539_p8, %p4533_p2 }
  0x6f   : > { %4543 = shalt.err (!%p4540_p9)
}
  0x70   : > { %s4875_s2 = smov 192   ;;  %s4876_s27 = smov 12  }
  0x71   : > { %4239 = dma.hbm_to_vmem [thread:$0]  (!%p5111_p4), %s5119_s4, 3072, %s5121_s30, %s5123_s0, %s4875_s2, %s4875_s2, %s4876_s27  }
  0x72   : > { %s3779_s25 = sshll.u32 %s5108_s8, 6  ;;  %s3924_s1 = sshll.u32 %s4864_s6, 10 }
  0x73   : > { %s5918_s9 = sld [smem:[#allocation43_spill]]  ;;  %s721_s24 = scalar_lea.vmem [#allocation12], %s3779_s25 }
  0x74   : > { %s728_s18 = sshll.u32 %s721_s24, 4  ;;  %s4877_s11 = smov [#allocation9]   ;;  %s5160_s18 = int_to_ptr.vmem [resolvable:$true] %s728_s18 }
  0x75   : > { %s5162_s10 = sshll.u32 %s4877_s11, 4  ;;  %s631_s10 = int_to_ptr.vmem [resolvable:$true] %s5162_s10 }
  0x79   : > { %s5158_s14 = scalar_lea.hbm %s5918_s9, %s3924_s1  ;;  %s4549_s4 = scalar_lea.hbm %s5918_s9, 2048 }
  0x7a   : > { %s4544_s16 = scalar_lea.hbm %s5158_s14, 1024  ;;  %p4550_p6 = scmp.lt.u32.totalorder %s5158_s14, %s5918_s9 }
  0x7b   : > { %p4545_p11 = scmp.ne.s32.totalorder %s5158_s14, %s4544_s16  ;;  %p4551_p12 = scmp.lt.u32.totalorder %s4549_s4, %s4544_s16 }
  0x7c   : > { %p4553_p1 = scmp.lt.u32.totalorder %s4544_s16, %s5158_s14 }
  0x7d   : > { %p4547_p13 = pnand %p4545_p11, %p5129_p7  ;;  %p4552_p0 = por %p4551_p12, %p4550_p6 }
  0x7f   : > { %p4548_p2 = pneg %p4547_p13  ;;  %p4554_p3 = por %p4553_p1, %p4552_p0 }
  0x81   : > { %p4555_p5 = pnand %p4554_p3, %p4548_p2 }
  0x83   : > { %4558 = shalt.err (!%p4555_p5)
}
  0x84   : > { %s4559_s11 = scalar_lea.vmem %s5160_s18, 1024  ;;  %s4878_s27 = smov [#allocation12]  }
  0x85   : > { %p4560_p10 = scmp.ne.s32.totalorder %s5160_s18, %s4559_s11  ;;  %s4564_s25 = sshll.u32 %s4878_s27, 4  ;;  %s4565_s25 = int_to_ptr.vmem [resolvable:$false] %s4564_s25 }
  0x86   : > { %s4566_s1 = scalar_lea.vmem %s4565_s25, 2048  ;;  %p4567_p11 = scmp.lt.s32.totalorder %s5160_s18, %s4565_s25 }
  0x87   : > { %p4562_p8 = pnand %p4560_p10, %p5129_p7  ;;  %p4568_p13 = scmp.lt.s32.totalorder %s4566_s1, %s4559_s11 }
  0x89   : > { %p4563_p9 = pneg %p4562_p8  ;;  %p4569_p6 = por %p4568_p13, %p4567_p11 }
  0x8b   : > { %p4570_p12 = pnand %p4569_p6, %p4563_p9 }
  0x8d   : > { %4573 = shalt.err (!%p4570_p12)
}
  0x8e   : > { %s5871_s16 = smov 64   ;;  %s5878_s24 = smov 4  }
  0x8f   : > { %4242 = dma.hbm_to_vmem [thread:$0]  (!%p5111_p4), %s5158_s14, 1024, %s5160_s18, %s5123_s0, %s5871_s16, %s5871_s16, %s5878_s24  }
  0x90   : > { %s5919_s4 = sld [smem:[#allocation40_spill]]  ;;  %p5920_p0 = scmp.ne.s32.totalorder %s5910_s17, 0 }
  0x96   : > { %s4574_s5 = scalar_lea.hbm %s5919_s4, 16 }
  0x97   : > { %p4575_p2 = scmp.ne.s32.totalorder %s5919_s4, %s4574_s5  ;;  %p4581_p5 = scmp.lt.u32.totalorder %s4574_s5, %s5919_s4 }
  0x99   : > { %p4577_p1 = pnand %p4575_p2, %p5920_p0 }
  0x9b   : > { %p4578_p3 = pneg %p4577_p1 }
  0x9d   : > { %p4583_p10 = pnand %p4581_p5, %p4578_p3 }
  0x9f   : > { %4586 = shalt.err (!%p4583_p10)
}
  0xa0   : > { %s4587_s1 = scalar_lea.vmem %s631_s10, 16  ;;  %s4594_s14 = scalar_lea.vmem %s631_s10, 32 }
  0xa1   : > { %p4588_p8 = scmp.ne.s32.totalorder %s631_s10, %s4587_s1  ;;  %p4595_p13 = scmp.lt.s32.totalorder %s631_s10, %s631_s10 }
  0xa2   : > { %p4596_p6 = scmp.lt.s32.totalorder %s4594_s14, %s4587_s1 }
  0xa3   : > { %p4590_p9 = pnand %p4588_p8, %p5920_p0 }
  0xa4   : > { %p4597_p12 = por %p4596_p6, %p4595_p13 }
  0xa5   : > { %p4591_p11 = pneg %p4590_p9 }
  0xa7   : > { %p4598_p4 = pnand %p4597_p12, %p4591_p11 }
  0xa9   : > { %4601 = shalt.err (!%p4598_p4)
}
  0xaa   : > { %p5921_p2 = scmp.ne.s32.totalorder %s5907_s29, 0  ;;  %s4881_s12 = smov [#allocation16]  }
  0xab   : > { %s654_s5 = sshll.u32 %s4881_s12, 4  ;;  %s5876_s2 = sshll.u32 %s5108_s8, 7  ;;  %s655_s5 = int_to_ptr.vmem [resolvable:$true] %s654_s5 }
  0xac   : > { %4223 = dma.hbm_to_vmem [thread:$0]  (!%p5921_p2), %s5919_s4, 16, %s631_s10, [#allocation10]  }
  0xad   : > { %s5922_s20 = sld [smem:[#allocation54_spill]] }
  0xb3   : > { %s4602_s25 = scalar_lea.hbm %s5922_s20, 16 }
  0xb4   : > { %p4603_p4 = scmp.ne.s32.totalorder %s5922_s20, %s4602_s25  ;;  %p4609_p5 = scmp.lt.u32.totalorder %s4602_s25, %s5922_s20 }
  0xb6   : > { %p4605_p1 = pnand %p4603_p4, %p5920_p0 }
  0xb8   : > { %p4606_p3 = pneg %p4605_p1 }
  0xba   : > { %p4611_p10 = pnand %p4609_p5, %p4606_p3 }
  0xbc   : > { %4614 = shalt.err (!%p4611_p10)
}
  0xbd   : > { %s4615_s10 = scalar_lea.vmem %s655_s5, 16  ;;  %s4622_s30 = scalar_lea.vmem %s655_s5, 32 }
  0xbe   : > { %p4616_p8 = scmp.ne.s32.totalorder %s655_s5, %s4615_s10  ;;  %p4623_p13 = scmp.lt.s32.totalorder %s655_s5, %s655_s5 }
  0xbf   : > { %p4624_p6 = scmp.lt.s32.totalorder %s4622_s30, %s4615_s10 }
  0xc0   : > { %p4618_p9 = pnand %p4616_p8, %p5920_p0 }
  0xc1   : > { %p4625_p12 = por %p4624_p6, %p4623_p13 }
  0xc2   : > { %p4619_p11 = pneg %p4618_p9 }
  0xc4   : > { %p4626_p7 = pnand %p4625_p12, %p4619_p11 }
  0xc6   : > { %4629 = shalt.err (!%p4626_p7)
}
  0xc7   : > { %4229 = dma.hbm_to_vmem [thread:$0]  (!%p5921_p2), %s5922_s20, 16, %s655_s5, [#allocation17]  }
  0xc8   : > { %s5877_s16 = sshll.u32 %s4864_s6, 11  ;;  %s760_s27 = scalar_lea.vmem [#allocation13], %s5876_s2 }
  0xc9   : > { %s767_s25 = sshll.u32 %s760_s27, 4  ;;  %s5923_s13 = sld [smem:[#allocation47_spill]]  ;;  %s5237_s25 = int_to_ptr.vmem [resolvable:$true] %s767_s25 }
  0xca   : > { %p5924_p4 = scmp.ne.s32.totalorder %s5917_s3, 0 }
  0xcf   : > { %s5235_s18 = scalar_lea.hbm %s5923_s13, %s5877_s16  ;;  %s4635_s12 = scalar_lea.hbm %s5923_s13, 4096 }
  0xd0   : > { %s4630_s10 = scalar_lea.hbm %s5235_s18, 2048  ;;  %p4636_p5 = scmp.lt.u32.totalorder %s5235_s18, %s5923_s13 }
  0xd1   : > { %p4631_p7 = scmp.ne.s32.totalorder %s5235_s18, %s4630_s10  ;;  %p4637_p10 = scmp.lt.u32.totalorder %s4635_s12, %s4630_s10 }
  0xd2   : > { %p4639_p9 = scmp.lt.u32.totalorder %s4630_s10, %s5235_s18 }
  0xd3   : > { %p4633_p1 = pnand %p4631_p7, %p5924_p4  ;;  %p4638_p8 = por %p4637_p10, %p4636_p5 }
  0xd5   : > { %p4634_p3 = pneg %p4633_p1  ;;  %p4640_p11 = por %p4639_p9, %p4638_p8 }
  0xd7   : > { %p4641_p13 = pnand %p4640_p11, %p4634_p3 }
  0xd9   : > { %4644 = shalt.err (!%p4641_p13)
}
  0xda   : > { %s4645_s1 = scalar_lea.vmem %s5237_s25, 2048  ;;  %s4882_s14 = smov [#allocation13]  }
  0xdb   : > { %p4646_p6 = scmp.ne.s32.totalorder %s5237_s25, %s4645_s1  ;;  %s4650_s5 = sshll.u32 %s4882_s14, 4  ;;  %s4651_s5 = int_to_ptr.vmem [resolvable:$false] %s4650_s5 }
  0xdc   : > { %s4652_s30 = scalar_lea.vmem %s4651_s5, 4096  ;;  %p4653_p1 = scmp.lt.s32.totalorder %s5237_s25, %s4651_s5 }
  0xdd   : > { %p4648_p12 = pnand %p4646_p6, %p5924_p4  ;;  %p4654_p2 = scmp.lt.s32.totalorder %s4652_s30, %s4645_s1 }
  0xdf   : > { %p4649_p7 = pneg %p4648_p12  ;;  %p4655_p5 = por %p4654_p2, %p4653_p1 }
  0xe1   : > { %p4656_p10 = pnand %p4655_p5, %p4649_p7 }
  0xe3   : > { %4659 = shalt.err (!%p4656_p10)
}
  0xe4   : > { %p5925_p3 = scmp.ne.s32.totalorder %s5915_s23, 0  ;;  %s5926_s10 = smov 8  }
  0xe5   : > { %s5927_s12 = smov 128   ;;  %s4883_s11 = smov [#allocation15]  }
  0xe6   : > { %4245 = dma.hbm_to_vmem [thread:$0]  (!%p5925_p3), %s5235_s18, 2048, %s5237_s25, %s5123_s0, %s5927_s12, %s5927_s12, %s5926_s10  }
  0xe7   : > { %s640_s27 = sshll.u32 %s4883_s11, 4  ;;  %s4884_s14 = smov [#allocation18]   ;;  %s641_s27 = int_to_ptr.vmem [resolvable:$true] %s640_s27 }
  0xe8   : > { %s664_s2 = sshll.u32 %s4884_s14, 4  ;;  %s5928_s19 = sld [smem:[#allocation53_spill]]  ;;  %s5264_s2 = int_to_ptr.vmem [resolvable:$true] %s664_s2 }
  0xee   : > { %s4660_s30 = scalar_lea.hbm %s5928_s19, 1024 }
  0xef   : > { %p4661_p2 = scmp.ne.s32.totalorder %s5928_s19, %s4660_s30  ;;  %p4667_p11 = scmp.lt.u32.totalorder %s4660_s30, %s5928_s19 }
  0xf1   : > { %p4663_p8 = pnand %p4661_p2, %p5920_p0 }
  0xf3   : > { %p4664_p9 = pneg %p4663_p8 }
  0xf5   : > { %p4669_p13 = pnand %p4667_p11, %p4664_p9 }
  0xf7   : > { %4672 = shalt.err (!%p4669_p13)
}
  0xf8   : > { %s4673_s18 = scalar_lea.vmem %s641_s27, 1024  ;;  %p4681_p1 = scmp.lt.s32.totalorder %s641_s27, %s641_s27 }
  0xf9   : > { %p4674_p6 = scmp.ne.s32.totalorder %s641_s27, %s4673_s18  ;;  %p4682_p5 = scmp.lt.s32.totalorder %s4673_s18, %s4673_s18 }
  0xfb   : > { %p4676_p12 = pnand %p4674_p6, %p5920_p0  ;;  %p4683_p10 = por %p4682_p5, %p4681_p1 }
  0xfd   : > { %p4677_p7 = pneg %p4676_p12 }
  0xff   : > { %p4684_p3 = pnand %p4683_p10, %p4677_p7 }
 0x101   : > { %4687 = shalt.err (!%p4684_p3)
}
 0x102   : > { %p5929_p2 = scmp.ne.s32.totalorder %s5907_s29, 0  ;;  %s5930_s24 = smov 4  }
 0x103   : > { %s5931_s16 = smov 64   ;;  %s4688_s14 = scalar_lea.hbm %s5845_s21, 1024 }
 0x104   : > { %4226 = dma.hbm_to_vmem [thread:$0]  (!%p5929_p2), %s5928_s19, 1024, %s641_s27, [#allocation10], %s5931_s16, %s5931_s16, %s5930_s24  }
 0x105   : > { %p4689_p8 = scmp.ne.s32.totalorder %s5845_s21, %s4688_s14  ;;  %p4695_p11 = scmp.lt.u32.totalorder %s4688_s14, %s5845_s21 }
 0x107   : > { %p4691_p3 = pnand %p4689_p8, %p5920_p0 }
 0x109   : > { %p4692_p9 = pneg %p4691_p3 }
 0x10b   : > { %p4697_p13 = pnand %p4695_p11, %p4692_p9 }
 0x10d   : > { %4700 = shalt.err (!%p4697_p13)
}
 0x10e   : > { %s4701_s27 = scalar_lea.vmem %s5264_s2, 1024  ;;  %p4709_p1 = scmp.lt.s32.totalorder %s5264_s2, %s5264_s2 }
 0x10f   : > { %p4702_p6 = scmp.ne.s32.totalorder %s5264_s2, %s4701_s27  ;;  %p4710_p5 = scmp.lt.s32.totalorder %s4701_s27, %s4701_s27 }
 0x111   : > { %p4704_p12 = pnand %p4702_p6, %p5920_p0  ;;  %p4711_p10 = por %p4710_p5, %p4709_p1 }
 0x113   : > { %p4705_p7 = pneg %p4704_p12 }
 0x115   : > { %p4712_p8 = pnand %p4711_p10, %p4705_p7 }
 0x117   : > { %4715 = shalt.err (!%p4712_p8)
}
 0x118   : > { %4232 = dma.hbm_to_vmem [thread:$0]  (!%p5929_p2), %s5845_s21, 1024, %s5264_s2, [#allocation17], %s5931_s16, %s5931_s16, %s5930_s24  }
 0x119   : > { %s4885_s10 = smov [#allocation19]   ;;  %s5932_s11 = sshll.u32 %s4864_s6, 11 }
 0x11a   : > { %s678_s12 = sshll.u32 %s4885_s10, 4  ;;  %s5933_s15 = sld [smem:[#allocation49_spill]]  ;;  %s679_s12 = int_to_ptr.vmem [resolvable:$true] %s678_s12 }
 0x11b   : > { %s5934_s30 = sshll.u32 %s5108_s8, 7  ;;  %s4716_s18 = scalar_lea.hbm %s5846_s22, 16 }
 0x11c   : > { %s788_s25 = scalar_lea.vmem [#allocation14], %s5934_s30  ;;  %p4717_p3 = scmp.ne.s32.totalorder %s5846_s22, %s4716_s18 }
 0x11d   : > { %s795_s27 = sshll.u32 %s788_s25, 4  ;;  %p4723_p13 = scmp.lt.u32.totalorder %s4716_s18, %s5846_s22  ;;  %s5340_s27 = int_to_ptr.vmem [resolvable:$true] %s795_s27 }
 0x11e   : > { %p4719_p9 = pnand %p4717_p3, %p5920_p0 }
 0x120   : > { %s5318_s5 = scalar_lea.hbm %s5933_s15, %s5932_s11  ;;  %p4720_p11 = pneg %p4719_p9 }
 0x122   : > { %p4725_p6 = pnand %p4723_p13, %p4720_p11 }
 0x124   : > { %4728 = shalt.err (!%p4725_p6)
}
 0x125   : > { %s4729_s8 = scalar_lea.vmem %s679_s12, 16  ;;  %s4736_s9 = scalar_lea.vmem %s679_s12, 32 }
 0x126   : > { %p4730_p12 = scmp.ne.s32.totalorder %s679_s12, %s4729_s8  ;;  %p4737_p5 = scmp.lt.s32.totalorder %s679_s12, %s679_s12 }
 0x127   : > { %p4738_p10 = scmp.lt.s32.totalorder %s4736_s9, %s4729_s8 }
 0x128   : > { %p4732_p7 = pnand %p4730_p12, %p5920_p0 }
 0x129   : > { %p4739_p8 = por %p4738_p10, %p4737_p5 }
 0x12a   : > { %p4733_p1 = pneg %p4732_p7 }
 0x12c   : > { %p4740_p4 = pnand %p4739_p8, %p4733_p1 }
 0x12e   : > { %4743 = shalt.err (!%p4740_p4)
}
 0x12f   : > { %4235 = dma.hbm_to_vmem [thread:$0]  (!%p5929_p2), %s5846_s22, 16, %s679_s12, [#allocation20]  }
 0x130   : > { %s4744_s17 = scalar_lea.hbm %s5318_s5, 2048  ;;  %p5935_p3 = scmp.ne.s32.totalorder %s5917_s3, 0 }
 0x131   : > { %p4745_p0 = scmp.ne.s32.totalorder %s5318_s5, %s4744_s17  ;;  %s4749_s29 = scalar_lea.hbm %s5933_s15, 4096 }
 0x132   : > { %p4750_p4 = scmp.lt.u32.totalorder %s5318_s5, %s5933_s15  ;;  %p4751_p13 = scmp.lt.u32.totalorder %s4749_s29, %s4744_s17 }
 0x133   : > { %p4747_p9 = pnand %p4745_p0, %p5935_p3  ;;  %p4753_p12 = scmp.lt.u32.totalorder %s4744_s17, %s5318_s5 }
 0x134   : > { %p4752_p6 = por %p4751_p13, %p4750_p4 }
 0x135   : > { %p4748_p11 = pneg %p4747_p9 }
 0x136   : > { %p4754_p7 = por %p4753_p12, %p4752_p6 }
 0x138   : > { %p4755_p2 = pnand %p4754_p7, %p4748_p11 }
 0x13a   : > { %4758 = shalt.err (!%p4755_p2)
}
 0x13b   : > { %s4759_s12 = scalar_lea.vmem %s5340_s27, 2048  ;;  %s4886_s30 = smov [#allocation14]  }
 0x13c   : > { %p4760_p1 = scmp.ne.s32.totalorder %s5340_s27, %s4759_s12  ;;  %s4764_s25 = sshll.u32 %s4886_s30, 4  ;;  %s4765_s25 = int_to_ptr.vmem [resolvable:$false] %s4764_s25 }
 0x13d   : > { %s4766_s18 = scalar_lea.vmem %s4765_s25, 4096  ;;  %p4767_p8 = scmp.lt.s32.totalorder %s5340_s27, %s4765_s25 }
 0x13e   : > { %p4762_p5 = pnand %p4760_p1, %p5935_p3  ;;  %p4768_p0 = scmp.lt.s32.totalorder %s4766_s18, %s4759_s12 }
 0x140   : > { %p4763_p10 = pneg %p4762_p5  ;;  %p4769_p9 = por %p4768_p0, %p4767_p8 }
 0x142   : > { %p4770_p4 = pnand %p4769_p9, %p4763_p10 }
 0x144   : > { %4773 = shalt.err (!%p4770_p4)
}
 0x145   : > { %p5936_p11 = scmp.ne.s32.totalorder %s5915_s23, 0  ;;  %p5937_p3 = scmp.ne.s32.totalorder %s5906_s28, 0 }
 0x146   : > { %p5938_p13 = scmp.eq.s32.totalorder (!%p5937_p3), %s5040_s7, 0 }
 0x147   : > { %4248 = dma.hbm_to_vmem [thread:$0]  (!%p5936_p11), %s5318_s5, 2048, %s5340_s27, %s5123_s0, %s5931_s16, %s5931_s16, %s5930_s24  }
 0x148   : > { %825 = sbr.rel (%p5937_p3) target bundleno = 5225 (0x1469), region = 108 }
 0x14f   : > { %4823 = dma.done.wait (%p5938_p13), [#allocation7], 512   ;;  %p5939_p6 = pmov %p5938_p13 }
 0x151   : > { %4825 = vsyncadd (%p5939_p6), [#allocation7], 4294966784  ;;  %p5940_p12 = pmov %p5939_p6 }
 0x152   : > { %p5941_p7 = pmov %p5939_p6 }
 0x153   : > { %4827 = dma.done.wait (%p5940_p12), [#allocation10], 16  }
 0x154   : > { %4829 = vsyncadd (%p5941_p7), [#allocation10], 4294967280  ;;  %s5942_s3 = sld [smem:[#allocation33_spill]]  ;;  %s835_s23 = sand.u32 1, %s5040_s7  }
 0x155   : > { %s837_s0 = sand.u32 1, %s4856_s26   ;;  %s836_s28 = scalar_lea.sflag [#allocation7], %s835_s23 }
 0x156   : > { %s4179_s24 = smul.u32 192, %s837_s0 }
 0x158   : > { %s5379_s16 = scalar_lea.vmem [#allocation11], %s4179_s24 }
 0x15a   : > { %p5943_p2 = scmp.ne.s32.totalorder %s5942_s3, 0 }
 0x15c   : > { %4831 = dma.done.wait (%p5943_p2), %s836_s28, 8192  }
 0x15d   : > { %4833 = vsyncadd (%p5943_p2), %s836_s28, 4294959104  ;;  %s3791_s5 = sshll.u32 %s837_s0, 6  ;;  %s3792_s27 = sshll.u32 %s837_s0, 7 }
 0x15e   : > { %s5385_s4 = scalar_lea.vmem [#allocation12], %s3791_s5  ;;  %s5387_s6 = scalar_lea.vmem [#allocation13], %s3792_s27 }
 0x15f   : > { %s5389_s2 = scalar_lea.vmem [#allocation14], %s3792_s27  ;;  %p5944_p1 = pmov %p5939_p6 }
 0x161   : > { %4835 = dma.done.wait (%p5944_p1), [#allocation10], 1024   ;;  %p5945_p5 = pmov %p5944_p1 }
 0x162   : > { %p5946_p10 = pmov %p5944_p1 }
 0x163   : > { %4837 = vsyncadd (%p5945_p5), [#allocation10], 4294966272 }
 0x164   : > { %4839 = dma.done.wait (%p5946_p10), [#allocation17], 1040   ;;  %p5947_p8 = pmov %p5944_p1 }
 0x165   : > { %p5948_p0 = pmov %p5944_p1 }
 0x166   : > { %4841 = vsyncadd (%p5947_p8), [#allocation17], 4294966256 }
 0x167   : > { %4843 = dma.done.wait (%p5948_p0), [#allocation20], 16   ;;  %p5949_p9 = pmov %p5948_p0 }
 0x168   : > { %p979_p4 = scmp.lt.s32.totalorder %s5040_s7, 1  ;;  %s5950_s17 = sld [smem:[#allocation44_spill]] }
 0x169   : > { %4845 = vsyncadd (%p5949_p9), [#allocation20], 4294967280  ;;  %s5953_s0 = sld [smem:[#allocation42_spill]]  ;;  %s5954_s15 = sld [smem:[#allocation48_spill]] }
 0x16a   : > { %s5405_s8 = scalar_select %p979_p4, %s5040_s7, 1 }
 0x16b   : > { %s5956_s1 = sld [smem:[#allocation51_spill]]  ;;  %s5957_s18 = sld [smem:[#allocation52_spill]] }
 0x16c   : > { %s4180_s9 = smul.u32 3, %s5405_s8  ;;  %s3798_s28 = sshll.u32 %s5405_s8, 1 }
 0x16d   : > { %p5958_p11 = scmp.ne.s32.totalorder %s5040_s7, 0 }
 0x16e   : > { %s985_s10 = scalar_lea.vmem %s5950_s17, %s5405_s8  ;;  %s5955_s17 = sld [smem:[#allocation50_spill]] }
 0x16f   : > { %s5423_s24 = scalar_lea.vmem %s5953_s0, %s4180_s9  ;;  %s5429_s20 = scalar_lea.vmem %s5954_s15, %s3798_s28 }
 0x170   : > { %1009 = sbr.rel (%p5958_p11) target bundleno = 714 (0x2ca), region = 152  ;;  %s5959_s0 = sld [smem:[#allocation38_spill]] (!%p5958_p11) }
 0x171   : > { %s1001_s12 = scalar_lea.vmem %s5956_s1, %s5405_s8  ;;  %s1004_s3 = scalar_lea.vmem %s5957_s18, %s5405_s8 }
 0x172   : > { %s4866_s15 = smov (!%p5958_p11), 0  }
 0x174   : > { %s998_s11 = scalar_lea.vmem %s5955_s17, %s5405_s8 }
 0x176   : > { %v1010_v0 = vld [vmem:[%s5959_s0] sm:$0x1] (!%p5958_p11) }
 0x177 LB: >> { %s1017_s28 = sld [smem:[#allocation5 + %s4868_s15]]  ;;  %p1018_p3 = scmp.lt.s32.totalorder %s4868_s15, 0  ;;  %s4868_s15 = sphi %s4866_s15, %s1016_s15  }
 0x178   : >> { %s1019_s5 = ssub.s32 0, %s4868_s15  ;;  %s5960_s17 = sld [smem:[#allocation36_spill]] }
 0x179   : >> { %s3800_s27 = smin.u32 %s4868_s15, %s1019_s5  ;;  %s1036_s25 = scalar_lea.vmem [#allocation2], %s4868_s15 }
 0x17a   : >> { %s1021_s1 = sand.u32 7, %s3800_s27   ;;  %s1016_s15 = sadd.s32 1, %s4868_s15  }
 0x17b   : >> { %s1022_s13 = ssub.s32 0, %s1021_s1  ;;  %p1013_p6 = scmp.ge.s32.totalorder %s1016_s15, 16  }
 0x17c   : >> { %s5978_s13 = smov (!%p1018_p3, %s1022_s13), %s1021_s1  ;;  %s5961_s0 = sld [smem:[#allocation39_spill]] (%p1013_p6)  ;;  %v3804_v24 = vld [vmem:[#allocation9] ss:$0 sm:$0xff] (%p1013_p6) }
 0x17d   : >> { %p3802_p13 = scmp.lt.s32.totalorder %s5978_s13, 0  ;;  %s1028_s14 = sadd.s32 8, %s5978_s13 }
 0x17e   : >> { %s1030_s29 = scalar_lea.vmem %s5960_s17, %s1017_s28 }
 0x17f   : >> { %s5980_s14 = smov (!%p3802_p13, %s1028_s14), %s5978_s13  ;;  %v1031_v1 = vld [vmem:[%s1030_s29] sm:$0x1] }
 0x180   : >> { %s1032_s30 = scalar_lea.vmem [#allocation6], %s5980_s14  ;;  %1015 = sbr.rel (!%p1013_p6) target bundleno = 375 (0x177), region = 243 }
 0x181   : >> { %v1033_v2 = vld [vmem:[%s1032_s30] sm:$0x1] }
 0x182   : >> { %v1034_v3 = vadd.f32 %v1033_v2, %v1031_v1  ;;  %v3803_v22 = vld [vmem:[%s5961_s0] ss:$0 sm:$0xff] (%p1013_p6) }
 0x184   : >> { %v1035_v4 = vadd.f32 %v1034_v3, %v1010_v0 }
 0x186   : >> { %1037 = vst [vmem:[%s1036_s25] sm:$0x1] %v1035_v4 }
 0x18d   : > { %v1038_v5 = vld [vmem:[#allocation2] sm:$0xff]  ;;  %v1039_v6 = vld [vmem:[#allocation2 + $0x8] sm:$0xff] }
 0x18e   : > { %1042 = vadd.xlane.f32.xlu0 %v1038_v5 }
 0x192   : > { %1044 = vadd.xlane.f32.xlu0 %v1039_v6 }
 0x21b   : > { %v1043_v7 = vpop.xlane.xlu0 %1042 }
 0x21c   : > { %v1047_v8 = vmul.f32 0.0078125, %v1043_v7 }
 0x21e   : > { %v1049_v9 = vsub.f32 %v1038_v5, %v1047_v8 }
 0x21f   : > { %v1045_v10 = vpop.xlane.xlu0 %1044 }
 0x220   : > { %v1048_v11 = vmul.f32 0.0078125, %v1045_v10  ;;  %v1051_v12 = vmul.f32 %v1049_v9, %v1049_v9 }
 0x222   : > { %v1050_v13 = vsub.f32 %v1039_v6, %v1048_v11  ;;  %1053 = vadd.xlane.f32.xlu1 %v1051_v12 }
 0x224   : > { %v1052_v14 = vmul.f32 %v1050_v13, %v1050_v13 }
 0x226   : > { %1055 = vadd.xlane.f32.xlu1 %v1052_v14 }
 0x2af   : > { %v1054_v15 = vpop.xlane.xlu1 %1053 }
 0x2b0   : > { %v1057_v16 = vmul.f32 0.0078125, %v1054_v15 }
 0x2b2   : > { %v1059_v17 = vadd.f32 1e-12, %v1057_v16 }
 0x2b3   : > { %v1056_v18 = vpop.xlane.xlu1 %1055 }
 0x2b4   : > { %4326 = vrsqrt.f32 %v1059_v17  ;;  %v1058_v19 = vmul.f32 0.0078125, %v1056_v18 }
 0x2b6   : > { %v1060_v20 = vadd.f32 1e-12, %v1058_v19 }
 0x2b8   : > { %4328 = vrsqrt.f32 %v1060_v20 }
 0x2be   : > { %v4327_v21 = vpop.eup %4326 }
 0x2bf   : > { %v1063_v23 = vmul.f32 %v4327_v21, %v1049_v9 }
 0x2c1   : > { %v1071_v25 = vmul.f32 %v3803_v22, %v1063_v23 }
 0x2c2   : > { %v4329_v26 = vpop.eup %4328 }
 0x2c3   : > { %v1079_v27 = vadd.f32 %v3804_v24, %v1071_v25  ;;  %v1064_v28 = vmul.f32 %v4329_v26, %v1050_v13 }
 0x2c5   : > { %1081 = vst [vmem:[#allocation2] sm:$0xff] %v1079_v27  ;;  %v1072_v29 = vmul.f32 %v3803_v22, %v1064_v28 }
 0x2c7   : > { %v1080_v30 = vadd.f32 %v3804_v24, %v1072_v29 }
 0x2c9   : > { %1082 = vst [vmem:[#allocation2 + $0x8] sm:$0xff] %v1080_v30 }
 0x2ca PF: > { %v4330_v31 = vld [vmem:[%s5379_s16 + $0x4] ss:$12 sps:$4 sm:$0xff]   ;;  %v4332_v32 = vld [vmem:[%s5379_s16] ss:$12 sps:$4 sm:$0xff]   ;;  %v4887_v33 = vmov 0   ;;  %v4888_v34 = vmov 0.0   ;;  %v1120_v60 = vlaneseq }
 0x2cb   : > { %1295 = vmatprep.mubr.bf16.mxu0 %v4887_v33  ;;  %4017 = vmatprep.subr.bf16.mxu1 %v4888_v34  ;;  %v4333_v35 = vld [vmem:[%s5379_s16 + $0x1c] ss:$12 sps:$4 sm:$0xff]   ;;  %vm4889_vm0 = vmmov 0   ;;  %v4335_v36 = vld [vmem:[%s5379_s16 + $0x18] ss:$12 sps:$4 sm:$0xff]   ;;  %vm1352_vm1 = vcmask 261120  }
 0x2cc   : > { %1263 = vmatprep.subr.bf16.mxu0 %v4330_v31  ;;  %4033 = vmatprep.mubr.msk.bf16.mxu1 %vm4889_vm0, %v4888_v34  ;;  %v4336_v37 = vld [vmem:[%s5379_s16 + $0x34] ss:$12 sps:$4 sm:$0xff]   ;;  %v4338_v38 = vld [vmem:[%s5379_s16 + $0x30] ss:$12 sps:$4 sm:$0xff]   ;;  %v4339_v39 = vld [vmem:[%s5379_s16 + $0x4c] ss:$12 sps:$4 sm:$0xff]  }
 0x2cd   : > { %1264 = vmatpush1.bf16.msra.mxu0 %v4332_v32  ;;  %v4341_v40 = vld [vmem:[%s5379_s16 + $0x48] ss:$12 sps:$4 sm:$0xff]   ;;  %v4342_v41 = vld [vmem:[%s5379_s16 + $0x64] ss:$12 sps:$4 sm:$0xff]   ;;  %v4355_v43 = vld [vmem:[%s5379_s16 + $0x20] ss:$12 sps:$4 sm:$0xff]  }
 0x2ce   : > { %1265 = vmatprep.subr.bf16.mxu0 %v4333_v35  ;;  %v4354_v42 = vld [vmem:[%s5379_s16 + $0x8] ss:$12 sps:$4 sm:$0xff]   ;;  %v4344_v44 = vld [vmem:[%s5379_s16 + $0x60] ss:$12 sps:$4 sm:$0xff]   ;;  %v4356_v46 = vld [vmem:[%s5379_s16 + $0x38] ss:$12 sps:$4 sm:$0xff]  }
 0x2cf   : > { %4018 = vmatpush3.bf16.msra.mxu1 %v4354_v42  ;;  %v4345_v45 = vld [vmem:[%s5379_s16 + $0x7c] ss:$12 sps:$4 sm:$0xff]   ;;  %v4347_v47 = vld [vmem:[%s5379_s16 + $0x78] ss:$12 sps:$4 sm:$0xff]   ;;  %v4348_v48 = vld [vmem:[%s5379_s16 + $0x94] ss:$12 sps:$4 sm:$0xff]  }
 0x2d0   : > { %4019 = vmatprep.subr.bf16.mxu1 %v4888_v34  ;;  %v4357_v49 = vld [vmem:[%s5379_s16 + $0x50] ss:$12 sps:$4 sm:$0xff]   ;;  %v4351_v51 = vld [vmem:[%s5379_s16 + $0xac] ss:$12 sps:$4 sm:$0xff]   ;;  %v4358_v52 = vld [vmem:[%s5379_s16 + $0x68] ss:$12 sps:$4 sm:$0xff]  }
 0x2d1   : > { %1266 = vmatpush1.bf16.msra.mxu0 %v4335_v36  ;;  %v4350_v50 = vld [vmem:[%s5379_s16 + $0x90] ss:$12 sps:$4 sm:$0xff]   ;;  %v4353_v53 = vld [vmem:[%s5379_s16 + $0xa8] ss:$12 sps:$4 sm:$0xff]   ;;  %v4359_v56 = vld [vmem:[%s5379_s16 + $0x80] ss:$12 sps:$4 sm:$0xff]  }
 0x2d2   : > { %1267 = vmatprep.subr.bf16.mxu0 %v4336_v37  ;;  %v5482_v54 = vld [vmem:[#allocation2] sm:$0xff]  ;;  %v5484_v55 = vld [vmem:[#allocation2 + $0x8] sm:$0xff]  ;;  %v5501_v61 = vshrl.u32 %v1120_v60, 7  ;;  %s5962_s28 = sld [smem:[#allocation35_spill]]  ;;  %vm1429_vm2 = vcmask 64512   ;;  %s4891_s5 = smov 64  }
 0x2d3   : > { %4020 = vmatpush3.bf16.msra.mxu1 %v4355_v43  ;;  %v1085_v57 = vpack.c.bf16 %v5484_v55, %v5482_v54  ;;  %v4360_v58 = vld [vmem:[%s5379_s16 + $0x98] ss:$12 sps:$4 sm:$0xff]   ;;  %v4361_v59 = vld [vmem:[%s5379_s16 + $0xb0] ss:$12 sps:$4 sm:$0xff]   ;;  %s4890_s16 = smov 96   ;;  %s4892_s27 = smov 32  }
 0x2d4   : > { %4021 = vmatprep.subr.bf16.mxu1 %v4888_v34  ;;  %v1126_v62 = vsub.s32 1, %v5501_v61  ;;  %v1118_v63 = vld [vmem:[%s5423_s24] sm:$0x7]  ;;  %v1122_v0 = vsub.s32 0, %v5501_v61  ;;  %v1130_v9 = vsub.s32 2, %v5501_v61  ;;  %vm1685_vm3 = vcmask 523520  }
 0x2d5   : > { %1268 = vmatpush1.bf16.msra.mxu0 %v4338_v38  ;;  %vm1856_vm4 = vcmask 785920   ;;  %vm2027_vm5 = vcmask 1048320   ;;  %s5964_s29 = sld [smem:[#allocation45_spill]]  ;;  %s5966_s25 = sld [smem:[#allocation46_spill]] }
 0x2d6   : > { %1269 = vmatprep.subr.bf16.mxu0 %v4339_v39  ;;  %v1127_v1 = vrot.slane %v1118_v63, %v1126_v62  ;;  %v1123_v3 = vrot.slane %v1118_v63, %v1122_v0  ;;  %v1131_v12 = vrot.slane %v1118_v63, %v1130_v9  ;;  %p3901_p12 = scmp.ne.s32.totalorder %s5040_s7, 1 }
 0x2d7   : > { %4022 = vmatpush3.bf16.msra.mxu1 %v4356_v46  ;;  %vm4894_vm6 = vmmov (!%p3901_p12), 0   ;;  %vm3281_vm7 = vcmask (!%p3901_p12), 1040384  }
 0x2d8   : > { %4023 = vmatprep.subr.bf16.mxu1 %v4888_v34  ;;  %v5546_v19 = vld [vmem:[%s5962_s28] ss:$0 sm:$0xff] }
 0x2d9   : > { %1270 = vmatpush1.bf16.msra.mxu0 %v4341_v40 }
 0x2da   : > { %1271 = vmatprep.subr.bf16.mxu0 %v4342_v41 }
 0x2db   : > { %4024 = vmatpush3.bf16.msra.mxu1 %v4357_v49  ;;  %s5965_s14 = scalar_lea.vmem %s5964_s29, %s5405_s8  ;;  %s5967_s9 = scalar_lea.vmem %s5966_s25, %s5405_s8 }
 0x2dc   : > { %4025 = vmatprep.subr.bf16.mxu1 %v4888_v34 }
 0x2dd   : > { %1272 = vmatpush1.bf16.msra.mxu0 %v4344_v44 }
 0x2de   : > { %1273 = vmatprep.subr.bf16.mxu0 %v4345_v45 }
 0x2df   : > { %4026 = vmatpush3.bf16.msra.mxu1 %v4358_v52 }
 0x2e0   : > { %4027 = vmatprep.subr.bf16.mxu1 %v4888_v34 }
 0x2e1   : > { %1274 = vmatpush1.bf16.msra.mxu0 %v4347_v47 }
 0x2e2   : > { %1275 = vmatprep.subr.bf16.mxu0 %v4348_v48 }
 0x2e3   : > { %4028 = vmatpush3.bf16.msra.mxu1 %v4359_v56 }
 0x2e4   : > { %4029 = vmatprep.subr.bf16.mxu1 %v4888_v34 }
 0x2e5   : > { %1276 = vmatpush1.bf16.msra.mxu0 %v4350_v50 }
 0x2e6   : > { %1277 = vmatprep.subr.bf16.mxu0 %v4351_v51 }
 0x2e7   : > { %4030 = vmatpush3.bf16.msra.mxu1 %v4360_v58 }
 0x2e8   : > { %4031 = vmatprep.subr.bf16.mxu1 %v4888_v34 }
 0x2e9   : > { %1278 = vmatpush1.bf16.msra.mxu0 %v4353_v53 }
 0x2ea   : > { %4077 = vmatprep.subr.mxu0 %v4888_v34 }
 0x2eb   : > { %4032 = vmatpush3.bf16.msra.mxu1 %v4361_v59 }
 0x2ec   : > { %1296 = vmatmul.mubr.bf16.vlgmr.msra.gmra.mrb[0].mxu0 %v1085_v57  ;;  %4037 = vmatprep.subr.mxu1 %v4888_v34 }
 0x2ed   : > { %4079 = vmatprep.mubr.msk.f32.mxu0 %vm4889_vm0, %v4888_v34 }
 0x2ee   : > { %4034 = vmatmul.mubr.bf16.vlgmr.msra.gmra.mrb[0].mxu1 %v1085_v57 }
 0x2ef   : > { %4039 = vmatprep.mubr.msk.f32.mxu1 %vm4889_vm0, %v4888_v34 }
 0x3bf   : > { %v1297_v2 = vpop.f32.mrb[0].mxu0 }
 0x3c0   : > { %v1299_v4 = vpop.f32.mrb[1].mxu0  ;;  %v5519_v10 = vadd.f32 %v1297_v2, %v1123_v3 }
 0x3c1   : > { %v5510_v5 = vadd.f32 %v1299_v4, %v1127_v1  ;;  %v1301_v6 = vpop.f32.mrb[2].mxu0  ;;  %v1340_v13 = vpop.f32.mrb[0].mxu1 }
 0x3c2   : > { %v1303_v7 = vpop.f32.mrb[3].mxu0  ;;  %v5524_v11 = vadd.f32 %v1301_v6, %v1123_v3  ;;  %v5537_v14 = vadd.f32 %v1340_v13, %v1131_v12  ;;  %v4035_v15 = vpop.f32.mrb[1].mxu1  ;;  %v5598_v3 = vld [vmem:[%s5962_s28 + $0x1] ss:$0 sm:$0xff] }
 0x3c3   : > { %v5512_v8 = vadd.f32 %v1303_v7, %v1127_v1  ;;  %1517 = vrot.lane.b32.xlu1 %v5510_v5, %s4890_s16  ;;  %4038 = vmatpush3.xpose.msk.msra.mxu1 %vm1352_vm1, %v5510_v5  ;;  %v1343_v16 = vpop.f32.mrb[2].mxu1 }
 0x3c4   : > { %4042 = vmatprep.subr.mxu1 %v4888_v34  ;;  %v5539_v17 = vadd.f32 %v1343_v16, %v1131_v12  ;;  %v4036_v18 = vpop.f32.mrb[3].mxu1 }
 0x3c5   : > { %4078 = vmatpush3.xpose.msk.msra.mxu0 %vm1352_vm1, %v5512_v8 }
 0x3c6   : > { %4040 = vmatmul.mubr.msk.f32.vlgmr.msra.gmra.mrb[4].mxu1 %vm1352_vm1, %v5519_v10  ;;  %4087 = vmatprep.subr.mxu0 %v4888_v34 }
 0x3c7   : > { %1515 = vrot.lane.b32.xlu1 %v5519_v10, %s4890_s16  ;;  %4044 = vmatprep.mubr.msk.f32.mxu1 %vm4889_vm0, %v4888_v34 }
 0x3c8   : > { %4080 = vmatmul.mubr.msk.f32.vlgmr.msra.gmra.mrb[4].mxu0 %vm1352_vm1, %v5524_v11  ;;  %4043 = vmatpush3.msra.mxu1 %v5537_v14 }
 0x3c9   : > { %4089 = vmatprep.mubr.msk.f32.mxu0 %vm4889_vm0, %v4888_v34  ;;  %4047 = vmatprep.subr.mxu1 %v4888_v34 }
 0x435   : > { %v1518_v35 = vpop.permute.xlu1 %1517 }
 0x439   : > { %v1516_v37 = vpop.permute.xlu1 %1515 }
 0x499   : > { %v1425_v20 = vpop.f32.mrb[4].mxu1 }
 0x49a   : > { %v1426_v21 = vadd.f32 %v5546_v19, %v1425_v20  ;;  %v4041_v22 = vpop.f32.mrb[5].mxu1 }
 0x49b   : > { %v5549_v23 = vpop.f32.mrb[4].mxu0 }
 0x49c   : > { %v4081_v24 = vpop.f32.mrb[5].mxu0  ;;  %v1430_v25 = vsel %vm1429_vm2, %v1426_v21, -inf  ;;  %v2107_v4 = vadd.f32 %v5598_v3, %v5549_v23 }
 0x49d   : > { %1431 = vmax.xlane.f32.xlu0 %v1430_v25 }
 0x52a   : > { %v1432_v26 = vpop.xlane.xlu0 %1431 }
 0x52b   : > { %v1433_v27 = vsub.f32 %v1426_v21, %v1432_v26 }
 0x52d   : > { %v1434_v28 = vmul.f32 1.442695, %v1433_v27 }
 0x52f   : > { %4410 = vpow2.f32 %v1434_v28 }
 0x539   : > { %v4411_v29 = vpop.eup %4410 }
 0x53a   : > { %v1436_v30 = vsel %vm1429_vm2, %v4411_v29, 0.0 }
 0x53b   : > { %1437 = vadd.xlane.f32.xlu0 %v1436_v30 }
 0x5c8   : > { %v1438_v31 = vpop.xlane.xlu0 %1437 }
 0x5c9   : > { %4412 = vrcp.f32 %v1438_v31 }
 0x5d3   : > { %v4413_v32 = vpop.eup %4412 }
 0x5d4   : > { %v1440_v36 = vmul.f32 %v4413_v32, %v4411_v29 }
 0x5d6   : > { %4045 = vmatmul.mubr.msk.f32.vlgmr.msra.gmra.mrb[6].mxu1 %vm1429_vm2, %v1440_v36 }
 0x5d7   : > { %4048 = vmatpush3.xpose.msk.msra.mxu1 %vm1352_vm1, %v1518_v35  ;;  %4049 = vmatprep.mubr.msk.f32.mxu1 %vm4889_vm0, %v4888_v34 }
 0x5d8   : > { %4052 = vmatprep.subr.mxu1 %v4888_v34 }
 0x5da   : > { %4050 = vmatmul.mubr.msk.f32.vlgmr.msra.gmra.mrb[8].mxu1 %vm1352_vm1, %v1516_v37 }
 0x5db   : > { %4054 = vmatprep.mubr.msk.f32.mxu1 %vm4889_vm0, %v4888_v34 }
 0x6a9   : > { %v1510_v38 = vpop.f32.mrb[6].mxu1 }
 0x6aa   : > { %1514 = vst.msk [vmem:[#allocation3] sm:$0xff] %vm1352_vm1, %v1510_v38  ;;  %v4046_v39 = vpop.f32.mrb[7].mxu1 }
 0x6ad   : > { %v1589_v40 = vpop.f32.mrb[8].mxu1 }
 0x6ae   : > { %v1590_v41 = vadd.f32 %v5546_v19, %v1589_v40  ;;  %v4051_v42 = vpop.f32.mrb[9].mxu1 }
 0x6b0   : > { %v1593_v43 = vsel %vm1429_vm2, %v1590_v41, -inf }
 0x6b1   : > { %1594 = vmax.xlane.f32.xlu0 %v1593_v43 }
 0x6c7   : > { %1605 = vrot.lane.b32.xlu0 %v5537_v14, %s4890_s16 }
 0x6cb   : > { %1689 = vrot.lane.b32.xlu0 %v5510_v5, %s4891_s5 }
 0x6cf   : > { %1687 = vrot.lane.b32.xlu0 %v5519_v10, %s4891_s5 }
 0x73e   : > { %v1595_v44 = vpop.xlane.xlu0 %1594 }
 0x73f   : > { %v1596_v45 = vsub.f32 %v1590_v41, %v1595_v44 }
 0x741   : > { %v1597_v46 = vmul.f32 1.442695, %v1596_v45 }
 0x742   : > { %v1606_v47 = vpop.permute.xlu0 %1605 }
 0x743   : > { %4414 = vpow2.f32 %v1597_v46  ;;  %4053 = vmatpush3.msra.mxu1 %v1606_v47 }
 0x744   : > { %4057 = vmatprep.subr.mxu1 %v4888_v34 }
 0x746   : > { %v1690_v52 = vpop.permute.xlu0 %1689 }
 0x74a   : > { %v1688_v56 = vpop.permute.xlu0 %1687 }
 0x74d   : > { %v4415_v48 = vpop.eup %4414 }
 0x74e   : > { %v1599_v49 = vsel %vm1429_vm2, %v4415_v48, 0.0 }
 0x74f   : > { %1600 = vadd.xlane.f32.xlu1 %v1599_v49 }
 0x760   : > { %1776 = vrot.lane.b32.xlu1 %v5537_v14, %s4891_s5 }
 0x764   : > { %1860 = vrot.lane.b32.xlu1 %v5510_v5, %s4892_s27  ;;  %v2110_v5 = vsel %vm1429_vm2, %v2107_v4, -inf }
 0x768   : > { %1858 = vrot.lane.b32.xlu1 %v5519_v10, %s4892_s27 }
 0x76c   : > { %2195 = vrot.lane.b32.xlu1 %v5524_v11, %s4890_s16 }
 0x7dc   : > { %v1601_v50 = vpop.xlane.xlu1 %1600 }
 0x7dd   : > { %4416 = vrcp.f32 %v1601_v50 }
 0x7e0   : > { %v1777_v57 = vpop.permute.xlu1 %1776 }
 0x7e4   : > { %v1861_v6 = vpop.permute.xlu1 %1860 }
 0x7e7   : > { %v4417_v51 = vpop.eup %4416 }
 0x7e8   : > { %v1603_v53 = vmul.f32 %v4417_v51, %v4415_v48  ;;  %v1859_v9 = vpop.permute.xlu1 %1858 }
 0x7ea   : > { %4055 = vmatmul.mubr.msk.f32.vlgmr.msra.gmra.mrb[10].mxu1 %vm1429_vm2, %v1603_v53 }
 0x7eb   : > { %4058 = vmatpush3.xpose.msk.msra.mxu1 %vm1352_vm1, %v1690_v52  ;;  %4059 = vmatprep.mubr.msk.f32.mxu1 %vm4889_vm0, %v4888_v34 }
 0x7ec   : > { %4062 = vmatprep.subr.mxu1 %v4888_v34  ;;  %v2196_v15 = vpop.permute.xlu1 %2195 }
 0x7ee   : > { %4060 = vmatmul.mubr.msk.f32.vlgmr.msra.gmra.mrb[12].mxu1 %vm1352_vm1, %v1688_v56 }
 0x7ef   : > { %4063 = vmatpush3.msra.mxu1 %v1777_v57  ;;  %4064 = vmatprep.mubr.msk.f32.mxu1 %vm4889_vm0, %v4888_v34 }
 0x7f0   : > { %4067 = vmatprep.subr.mxu1 %v4888_v34 }
 0x8bd   : > { %v5589_v58 = vpop.f32.mrb[10].mxu1 }
 0x8be   : > { %v4056_v59 = vpop.f32.mrb[11].mxu1 }
 0x8c1   : > { %v1761_v60 = vpop.f32.mrb[12].mxu1 }
 0x8c2   : > { %v1762_v63 = vadd.f32 %v5546_v19, %v1761_v60  ;;  %v4061_v1 = vpop.f32.mrb[13].mxu1 }
 0x8c4   : > { %v1765_v2 = vsel %vm1429_vm2, %v1762_v63, -inf }
 0x8c5   : > { %1766 = vmax.xlane.f32.xlu0 %v1765_v2 }
 0x8db   : > { %2197 = vrot.lane.b32.xlu0 %v5512_v8, %s4890_s16 }
 0x8fa   : > { %2111 = vmax.xlane.f32.xlu0 %v2110_v5 }
 0x952   : > { %v1767_v7 = vpop.xlane.xlu0 %1766 }
 0x953   : > { %v1768_v10 = vsub.f32 %v1762_v63, %v1767_v7 }
 0x955   : > { %v1769_v12 = vmul.f32 1.442695, %v1768_v10 }
 0x956   : > { %v2198_v13 = vpop.permute.xlu0 %2197 }
 0x957   : > { %4418 = vpow2.f32 %v1769_v12  ;;  %4088 = vmatpush3.xpose.msk.msra.mxu0 %vm1352_vm1, %v2198_v13 }
 0x958   : > { %4097 = vmatprep.subr.mxu0 %v4888_v34 }
 0x95a   : > { %4090 = vmatmul.mubr.msk.f32.vlgmr.msra.gmra.mrb[6].mxu0 %vm1352_vm1, %v2196_v15 }
 0x95b   : > { %4099 = vmatprep.mubr.msk.f32.mxu0 %vm4889_vm0, %v4888_v34 }
 0x961   : > { %v4419_v16 = vpop.eup %4418 }
 0x962   : > { %v1771_v18 = vsel %vm1429_vm2, %v4419_v16, 0.0 }
 0x963   : > { %1772 = vadd.xlane.f32.xlu1 %v1771_v18 }
 0x974   : > { %2368 = vrot.lane.b32.xlu1 %v5512_v8, %s4891_s5 }
 0x978   : > { %2366 = vrot.lane.b32.xlu1 %v5524_v11, %s4891_s5 }
 0x97c   : > { %2538 = vrot.lane.b32.xlu1 %v5512_v8, %s4892_s27 }
 0x980   : > { %2536 = vrot.lane.b32.xlu1 %v5524_v11, %s4892_s27 }
 0x987   : > { %v2112_v29 = vpop.xlane.xlu0 %2111 }
 0x988   : > { %v2113_v30 = vsub.f32 %v2107_v4, %v2112_v29 }
 0x98a   : > { %v2114_v32 = vmul.f32 1.442695, %v2113_v30 }
 0x9f0   : > { %v1773_v20 = vpop.xlane.xlu1 %1772 }
 0x9f1   : > { %4420 = vrcp.f32 %v1773_v20 }
 0x9f2   : > { %4422 = vpow2.f32 %v2114_v32  ;;  %v4362_v32 = vld [vmem:[%s5385_s4] sm:$0xff]  }
 0x9f4   : > { %v2369_v21 = vpop.permute.xlu1 %2368 }
 0x9f5   : > { %4098 = vmatpush3.xpose.msk.msra.mxu0 %vm1352_vm1, %v2369_v21 }
 0x9f6   : > { %4107 = vmatprep.subr.mxu0 %v4888_v34 }
 0x9f8   : > { %v2367_v22 = vpop.permute.xlu1 %2366 }
 0x9f9   : > { %4100 = vmatmul.mubr.msk.f32.vlgmr.msra.gmra.mrb[8].mxu0 %vm1352_vm1, %v2367_v22 }
 0x9fa   : > { %4109 = vmatprep.mubr.msk.f32.mxu0 %vm4889_vm0, %v4888_v34 }
 0x9fb   : > { %v4421_v23 = vpop.eup %4420 }
 0x9fc   : > { %v1775_v24 = vmul.f32 %v4421_v23, %v4419_v16  ;;  %v2539_v25 = vpop.permute.xlu1 %2538  ;;  %v5640_v48 = vpop.eup %4422 }
 0x9fd   : > { %4108 = vmatpush3.xpose.msk.msra.mxu0 %vm1352_vm1, %v2539_v25  ;;  %v2116_v51 = vsel %vm1429_vm2, %v5640_v48, 0.0 }
 0x9fe   : > { %4065 = vmatmul.mubr.msk.f32.vlgmr.msra.gmra.mrb[14].mxu1 %vm1429_vm2, %v1775_v24  ;;  %4117 = vmatprep.subr.bf16.mxu0 %v4888_v34 }
 0x9ff   : > { %4068 = vmatpush3.xpose.msk.msra.mxu1 %vm1352_vm1, %v1861_v6  ;;  %4069 = vmatprep.mubr.msk.f32.mxu1 %vm4889_vm0, %v4888_v34 }
 0xa00   : > { %v2537_v8 = vpop.permute.xlu1 %2536  ;;  %4072 = vmatprep.subr.mxu1 %v4888_v34 }
 0xa01   : > { %4110 = vmatmul.mubr.msk.f32.vlgmr.msra.gmra.mrb[10].mxu0 %vm1352_vm1, %v2537_v8 }
 0xa02   : > { %4070 = vmatmul.mubr.msk.f32.vlgmr.msra.gmra.mrb[16].mxu1 %vm1352_vm1, %v1859_v9  ;;  %4133 = vmatprep.mubr.msk.bf16.mxu0 %vm4889_vm0, %v4888_v34 }
 0xa03   : > { %4074 = vmatprep.mubr.msk.f32.mxu1 %vm4889_vm0, %v4888_v34  ;;  %4118 = vmatpush3.bf16.msra.mxu0 %v4362_v32 }
 0xa04   : > { %4119 = vmatprep.subr.bf16.mxu0 %v4888_v34 }
 0xa2d   : > { %v2269_v11 = vpop.f32.mrb[6].mxu0 }
 0xa2e   : > { %v2270_v26 = vadd.f32 %v5598_v3, %v2269_v11  ;;  %v4091_v27 = vpop.f32.mrb[7].mxu0 }
 0xa30   : > { %v2273_v28 = vsel %vm1429_vm2, %v2270_v26, -inf }
 0xa31   : > { %2274 = vmax.xlane.f32.xlu0 %v2273_v28 }
 0xabe   : > { %v2275_v31 = vpop.xlane.xlu0 %2274 }
 0xabf   : > { %v2276_v35 = vsub.f32 %v2270_v26, %v2275_v31 }
 0xac1   : > { %v2277_v38 = vmul.f32 1.442695, %v2276_v35  ;;  %v4363_v35 = vld [vmem:[%s5385_s4 + $0x8] sm:$0xff]  }
 0xac2   : > { %4120 = vmatpush3.bf16.msra.mxu0 %v4363_v35 }
 0xac3   : > { %4424 = vpow2.f32 %v2277_v38  ;;  %4121 = vmatprep.subr.bf16.mxu0 %v4888_v34 }
 0xacc   : > { %v2440_v36 = vpop.f32.mrb[8].mxu0 }
 0xacd   : > { %v4101_v37 = vpop.f32.mrb[9].mxu0  ;;  %v2441_v49 = vadd.f32 %v5598_v3, %v2440_v36  ;;  %v5647_v53 = vpop.eup %4424  ;;  %v4364_v36 = vld [vmem:[%s5385_s4 + $0x10] sm:$0xff]  }
 0xace   : > { %4122 = vmatpush3.bf16.msra.mxu0 %v4364_v36  ;;  %v4365_v37 = vld [vmem:[%s5385_s4 + $0x18] sm:$0xff]  }
 0xacf   : > { %v2444_v52 = vsel %vm1429_vm2, %v2441_v49, -inf  ;;  %4123 = vmatprep.subr.bf16.mxu0 %v4888_v34 }
 0xad1   : > { %v1848_v39 = vpop.f32.mrb[14].mxu1 }
 0xad2   : > { %v4066_v40 = vpop.f32.mrb[15].mxu1  ;;  %4124 = vmatpush3.bf16.msra.mxu0 %v4365_v37 }
 0xad3   : > { %4125 = vmatprep.subr.bf16.mxu0 %v4888_v34 }
 0xad4   : > { %v2610_v41 = vpop.f32.mrb[10].mxu0 }
 0xad5   : > { %v2611_v42 = vadd.f32 %v5598_v3, %v2610_v41  ;;  %v1932_v43 = vpop.f32.mrb[16].mxu1  ;;  %v4111_v44 = vpop.f32.mrb[11].mxu0 }
 0xad6   : > { %v1933_v45 = vadd.f32 %v5546_v19, %v1932_v43  ;;  %v4071_v46 = vpop.f32.mrb[17].mxu1  ;;  %v2279_v19 = vsel %vm1429_vm2, %v5647_v53, 0.0  ;;  %v4369_v44 = vld [vmem:[%s5385_s4 + $0x38] sm:$0xff]  }
 0xad7   : > { %v2614_v47 = vsel %vm1429_vm2, %v2611_v42, -inf }
 0xad8   : > { %2615 = vmax.xlane.f32.xlu0 %v2614_v47  ;;  %v1936_v50 = vsel %vm1429_vm2, %v1933_v45, -inf }
 0xad9   : > { %1937 = vmax.xlane.f32.xlu1 %v1936_v50 }
 0xadc   : > { %2117 = vadd.xlane.f32.xlu0 %v2116_v51 }
 0xadd   : > { %2445 = vmax.xlane.f32.xlu1 %v2444_v52 }
 0xae1   : > { %2280 = vadd.xlane.f32.xlu1 %v2279_v19 }
 0xb65   : > { %v2616_v56 = vpop.xlane.xlu0 %2615 }
 0xb66   : > { %v2617_v57 = vsub.f32 %v2611_v42, %v2616_v56  ;;  %v1938_v59 = vpop.xlane.xlu1 %1937  ;;  %v4368_v42 = vld [vmem:[%s5385_s4 + $0x30] sm:$0xff]  }
 0xb67   : > { %v1939_v60 = vsub.f32 %v1933_v45, %v1938_v59  ;;  %v3855_v59 = vld [vmem:[%s985_s10] ss:$0 sm:$0xff] }
 0xb68   : > { %v2618_v63 = vmul.f32 1.442695, %v2617_v57 }
 0xb69   : > { %v1940_v1 = vmul.f32 1.442695, %v1939_v60  ;;  %v2118_v16 = vpop.xlane.xlu0 %2117 }
 0xb6a   : > { %4426 = vpow2.f32 %v2618_v63  ;;  %v2446_v2 = vpop.xlane.xlu1 %2445 }
 0xb6b   : > { %v2447_v3 = vsub.f32 %v2441_v49, %v2446_v2  ;;  %4428 = vpow2.f32 %v1940_v1 }
 0xb6d   : > { %v2448_v4 = vmul.f32 1.442695, %v2447_v3 }
 0xb6e   : > { %v2281_v13 = vpop.xlane.xlu1 %2280 }
 0xb6f   : > { %4430 = vpow2.f32 %v2448_v4 }
 0xb74   : > { %v4427_v5 = vpop.eup %4426 }
 0xb75   : > { %v2620_v6 = vsel %vm1429_vm2, %v4427_v5, 0.0  ;;  %v4429_v7 = vpop.eup %4428 }
 0xb76   : > { %2621 = vadd.xlane.f32.xlu1 %v2620_v6  ;;  %v1942_v10 = vsel %vm1429_vm2, %v4429_v7, 0.0 }
 0xb79   : > { %v4431_v9 = vpop.eup %4430 }
 0xb7a   : > { %1943 = vadd.xlane.f32.xlu1 %v1942_v10  ;;  %v2450_v12 = vsel %vm1429_vm2, %v4431_v9, 0.0  ;;  %v4375_v10 = vld [vmem:[%s5387_s6 + $0x14] ss:$8 sps:$4 sm:$0xff]  }
 0xb7b   : > { %2451 = vadd.xlane.f32.xlu0 %v2450_v12  ;;  %v4373_v12 = vld [vmem:[%s5387_s6 + $0x10] ss:$8 sps:$4 sm:$0xff]  }
 0xb8b   : > { %2285 = vrot.lane.b32.xlu1 %v5539_v17, %s4890_s16 }
 0xb8f   : > { %2455 = vrot.lane.b32.xlu1 %v5539_v17, %s4891_s5 }
 0xb91   : > { %1947 = vrot.lane.b32.xlu0 %v5537_v14, %s4892_s27 }
 0xb93   : > { %1682 = vrot.lane.b32.xlu1 %v5589_v58, %s4892_s27 }
 0xb95   : > { %2625 = vrot.lane.b32.xlu0 %v5539_v17, %s4892_s27 }
 0xb97   : > { %1853 = vrot.lane.b32.xlu1 %v1848_v39, %s4891_s5  ;;  %v4367_v39 = vld [vmem:[%s5385_s4 + $0x28] sm:$0xff]  }
 0xc03   : > { %v2622_v15 = vpop.xlane.xlu1 %2621 }
 0xc07   : > { %v1944_v18 = vpop.xlane.xlu1 %1943 }
 0xc08   : > { %4432 = vrcp.f32 %v1944_v18  ;;  %v2452_v20 = vpop.xlane.xlu0 %2451 }
 0xc09   : > { %4434 = vrcp.f32 %v2118_v16 }
 0xc0a   : > { %4436 = vrcp.f32 %v2281_v13 }
 0xc0b   : > { %v2286_v21 = vpop.permute.xlu1 %2285  ;;  %4438 = vrcp.f32 %v2452_v20 }
 0xc0c   : > { %v1948_v22 = vpop.permute.xlu0 %1947  ;;  %4440 = vrcp.f32 %v2622_v15 }
 0xc0d   : > { %4073 = vmatpush3.msra.mxu1 %v1948_v22  ;;  %v4378_v22 = vld [vmem:[%s5387_s6 + $0x24] ss:$8 sps:$4 sm:$0xff]  }
 0xc0e   : > { %4082 = vmatprep.subr.mxu1 %v4888_v34 }
 0xc0f   : > { %v2456_v14 = vpop.permute.xlu1 %2455 }
 0xc10   : > { %v2626_v30 = vpop.permute.xlu0 %2625 }
 0xc12   : > { %v4433_v58 = vpop.eup %4432 }
 0xc13   : > { %v1946_v23 = vmul.f32 %v4433_v58, %v4429_v7  ;;  %v1683_v24 = vpop.permute.xlu1 %1682  ;;  %v4435_v25 = vpop.eup %4434  ;;  %v4370_v7 = vld [vmem:[%s5387_s6] ss:$8 sps:$4 sm:$0xff]   ;;  %v4381_v58 = vld [vmem:[%s5387_s6 + $0x34] ss:$8 sps:$4 sm:$0xff]  }
 0xc14   : > { %1686 = vst.msk [vmem:[#allocation3] sm:$0xff] %vm1685_vm3, %v1683_v24  ;;  %v2120_v8 = vmul.f32 %v4435_v25, %v5640_v48  ;;  %v4437_v26 = vpop.eup %4436  ;;  %v4384_v24 = vld [vmem:[%s5387_s6 + $0x44] ss:$8 sps:$4 sm:$0xff]   ;;  %v4382_v25 = vld [vmem:[%s5387_s6 + $0x40] ss:$8 sps:$4 sm:$0xff]  }
 0xc15   : > { %4075 = vmatmul.mubr.msk.f32.vlgmr.msra.gmra.mrb[18].mxu1 %vm1429_vm2, %v1946_v23  ;;  %v2283_v27 = vmul.f32 %v4437_v26, %v5647_v53  ;;  %v4379_v23 = vld [vmem:[%s5387_s6 + $0x30] ss:$8 sps:$4 sm:$0xff]   ;;  %v4388_v26 = vld [vmem:[%s5387_s6 + $0x60] ss:$8 sps:$4 sm:$0xff]  }
 0xc16   : > { %4083 = vmatpush3.msra.mxu1 %v5539_v17  ;;  %4084 = vmatprep.mubr.msk.f32.mxu1 %vm4889_vm0, %v4888_v34  ;;  %v4439_v17 = vpop.eup %4438 }
 0xc17   : > { %v1854_v11 = vpop.permute.xlu1 %1853  ;;  %4092 = vmatprep.subr.mxu1 %v4888_v34  ;;  %v2454_v28 = vmul.f32 %v4439_v17, %v4431_v9  ;;  %v4441_v29 = vpop.eup %4440  ;;  %v4372_v9 = vld [vmem:[%s5387_s6 + $0x4] ss:$8 sps:$4 sm:$0xff]   ;;  %v4393_v17 = vld [vmem:[%s5387_s6 + $0x74] ss:$8 sps:$4 sm:$0xff]  }
 0xc18   : > { %1857 = vst.msk [vmem:[#allocation3] sm:$0xff] %vm1856_vm4, %v1854_v11  ;;  %v2624_v31 = vmul.f32 %v4441_v29, %v4427_v5  ;;  %v4385_v11 = vld [vmem:[%s5387_s6 + $0x50] ss:$8 sps:$4 sm:$0xff]  }
 0xc19   : > { %4085 = vmatmul.mubr.msk.f32.vlgmr.msra.gmra.mrb[20].mxu1 %vm1429_vm2, %v2120_v8  ;;  %v4387_v8 = vld [vmem:[%s5387_s6 + $0x54] ss:$8 sps:$4 sm:$0xff]  }
 0xc1a   : > { %4093 = vmatpush3.msra.mxu1 %v2286_v21  ;;  %4094 = vmatprep.mubr.msk.f32.mxu1 %vm4889_vm0, %v4888_v34 }
 0xc1b   : > { %4102 = vmatprep.subr.mxu1 %v4888_v34 }
 0xc1d   : > { %4095 = vmatmul.mubr.msk.f32.vlgmr.msra.gmra.mrb[22].mxu1 %vm1429_vm2, %v2283_v27  ;;  %v4390_v27 = vld [vmem:[%s5387_s6 + $0x64] ss:$8 sps:$4 sm:$0xff]  }
 0xc1e   : > { %4103 = vmatpush3.msra.mxu1 %v2456_v14  ;;  %4104 = vmatprep.mubr.msk.f32.mxu1 %vm4889_vm0, %v4888_v34  ;;  %v4376_v14 = vld [vmem:[%s5387_s6 + $0x20] ss:$8 sps:$4 sm:$0xff]  }
 0xc1f   : > { %4112 = vmatprep.subr.mxu1 %v4888_v34 }
 0xc21   : > { %4105 = vmatmul.mubr.msk.f32.vlgmr.msra.gmra.mrb[24].mxu1 %vm1429_vm2, %v2454_v28  ;;  %v4391_v28 = vld [vmem:[%s5387_s6 + $0x70] ss:$8 sps:$4 sm:$0xff]  }
 0xc22   : > { %4113 = vmatpush3.msra.mxu1 %v2626_v30  ;;  %4114 = vmatprep.mubr.msk.f32.mxu1 %vm4889_vm0, %v4888_v34 }
 0xc23   : > { %2973 = vmatprep.subr.bf16.mxu1 %v4372_v9 }
 0xc25   : > { %4115 = vmatmul.mubr.msk.f32.vlgmr.msra.gmra.mrb[26].mxu1 %vm1429_vm2, %v2624_v31 }
 0xc26   : > { %3005 = vmatprep.mubr.bf16.mxu1 %v4887_v33  ;;  %v4366_v33 = vld [vmem:[%s5385_s4 + $0x20] sm:$0xff]   ;;  %2974 = vmatpush1.bf16.msra.mxu1 %v4370_v7 }
 0xc27   : > { %4126 = vmatpush3.bf16.msra.mxu0 %v4366_v33  ;;  %2975 = vmatprep.subr.bf16.mxu1 %v4375_v10  ;;  %v3864_v33 = vld [vmem:[%s5965_s14] ss:$0 sm:$0xff] }
 0xc28   : > { %4127 = vmatprep.subr.bf16.mxu0 %v4888_v34 }
 0xc2a   : > { %2976 = vmatpush1.bf16.msra.mxu1 %v4373_v12 }
 0xc2b   : > { %4128 = vmatpush3.bf16.msra.mxu0 %v4367_v39  ;;  %2977 = vmatprep.subr.bf16.mxu1 %v4378_v22 }
 0xc2c   : > { %4129 = vmatprep.subr.bf16.mxu0 %v4888_v34 }
 0xc2e   : > { %2978 = vmatpush1.bf16.msra.mxu1 %v4376_v14 }
 0xc2f   : > { %4130 = vmatpush3.bf16.msra.mxu0 %v4368_v42  ;;  %2979 = vmatprep.subr.bf16.mxu1 %v4381_v58  ;;  %v3865_v42 = vld [vmem:[%s5967_s9] ss:$0 sm:$0xff] }
 0xc30   : > { %4131 = vmatprep.subr.bf16.mxu0 %v4888_v34 }
 0xc32   : > { %2980 = vmatpush1.bf16.msra.mxu1 %v4379_v23 }
 0xc33   : > { %4132 = vmatpush3.bf16.msra.mxu0 %v4369_v44  ;;  %2981 = vmatprep.subr.bf16.mxu1 %v4384_v24 }
 0xc36   : > { %2982 = vmatpush1.bf16.msra.mxu1 %v4382_v25 }
 0xc37   : > { %2983 = vmatprep.subr.bf16.mxu1 %v4387_v8 }
 0xc3a   : > { %2984 = vmatpush1.bf16.msra.mxu1 %v4385_v11 }
 0xc3b   : > { %2985 = vmatprep.subr.bf16.mxu1 %v4390_v27 }
 0xc3e   : > { %2986 = vmatpush1.bf16.msra.mxu1 %v4388_v26 }
 0xc3f   : > { %2987 = vmatprep.subr.bf16.mxu1 %v4393_v17 }
 0xc42   : > { %2988 = vmatpush1.bf16.msra.mxu1 %v4391_v28 }
 0xce8   : > { %v2019_v38 = vpop.f32.mrb[18].mxu1 }
 0xce9   : > { %2024 = vrot.lane.b32.xlu1 %v2019_v38, %s4890_s16  ;;  %v4076_v40 = vpop.f32.mrb[19].mxu1 }
 0xcec   : > { %v2190_v41 = vpop.f32.mrb[20].mxu1 }
 0xced   : > { %2194 = vst.msk [vmem:[#allocation3 + $0x8] sm:$0xff] %vm1352_vm1, %v2190_v41  ;;  %v4086_v43 = vpop.f32.mrb[21].mxu1 }
 0xcf0   : > { %v2357_v45 = vpop.f32.mrb[22].mxu1 }
 0xcf1   : > { %2362 = vrot.lane.b32.xlu0 %v2357_v45, %s4892_s27  ;;  %v4096_v46 = vpop.f32.mrb[23].mxu1 }
 0xcf4   : > { %v2527_v47 = vpop.f32.mrb[24].mxu1 }
 0xcf5   : > { %2532 = vrot.lane.b32.xlu0 %v2527_v47, %s4891_s5  ;;  %v4106_v48 = vpop.f32.mrb[25].mxu1  ;;  %v4394_v47 = vld [vmem:[%s5389_s2 + $0x40] sm:$0xff]  }
 0xcf6   : > { %v4395_v48 = vld [vmem:[%s5389_s2] sm:$0xff]   ;;  %3977 = vmatprep.subr.bf16.mxu0 %v4394_v47 }
 0xcf8   : > { %v2697_v49 = vpop.f32.mrb[26].mxu1 }
 0xcf9   : > { %2702 = vrot.lane.b32.xlu0 %v2697_v49, %s4890_s16  ;;  %v4116_v50 = vpop.f32.mrb[27].mxu1  ;;  %v4396_v49 = vld [vmem:[%s5389_s2 + $0x48] sm:$0xff]  }
 0xcfa   : > { %v4397_v50 = vld [vmem:[%s5389_s2 + $0x8] sm:$0xff]  }
 0xd5b   : > { %v2025_v51 = vpop.permute.xlu1 %2024 }
 0xd5c   : > { %2028 = vst.msk [vmem:[#allocation3] sm:$0xff] %vm2027_vm5, %v2025_v51  ;;  %v4398_v51 = vld [vmem:[%s5389_s2 + $0x50] sm:$0xff]  }
 0xd63   : > { %v2363_v52 = vpop.permute.xlu0 %2362  ;;  %v2706_v19 = vld [vmem:[#allocation3] sm:$0xff] }
 0xd64   : > { %2365 = vst.msk [vmem:[#allocation3 + $0x8] sm:$0xff] %vm1685_vm3, %v2363_v52  ;;  %v4399_v52 = vld [vmem:[%s5389_s2 + $0x10] sm:$0xff]  }
 0xd67   : > { %v2533_v34 = vpop.permute.xlu0 %2532 }
 0xd68   : > { %2535 = vst.msk [vmem:[#allocation3 + $0x8] sm:$0xff] %vm1856_vm4, %v2533_v34  ;;  %v4400_v34 = vld [vmem:[%s5389_s2 + $0x58] sm:$0xff]  }
 0xd6b   : > { %v2703_v53 = vpop.permute.xlu0 %2702 }
 0xd6c   : > { %2705 = vst.msk [vmem:[#allocation3 + $0x8] sm:$0xff] %vm2027_vm5, %v2703_v53  ;;  %v4401_v53 = vld [vmem:[%s5389_s2 + $0x18] sm:$0xff]  }
 0xd73   : > { %v2707_v56 = vld [vmem:[#allocation3 + $0x8] sm:$0xff] }
 0xd74   : > { %v2708_v57 = vpack.c.bf16 %v2707_v56, %v2706_v19  ;;  %v4402_v19 = vld [vmem:[%s5389_s2 + $0x60] sm:$0xff]  }
 0xd75   : > { %v4403_v56 = vld [vmem:[%s5389_s2 + $0x20] sm:$0xff]  }
 0xd76   : > { %4134 = vmatmul.mubr.bf16.vlgmr.msra.gmra.mrb[12].mxu0 %v2708_v57  ;;  %v4404_v57 = vld [vmem:[%s5389_s2 + $0x68] sm:$0xff]  }
 0xd77   : > { %3978 = vmatpush3.bf16.msra.mxu0 %v4395_v48 }
 0xd78   : > { %3979 = vmatprep.subr.bf16.mxu0 %v4396_v49 }
 0xd7b   : > { %3980 = vmatpush3.bf16.msra.mxu0 %v4397_v50 }
 0xd7c   : > { %3981 = vmatprep.subr.bf16.mxu0 %v4398_v51  ;;  %v3882_v51 = vld [vmem:[%s998_s11] ss:$0 sm:$0xff] }
 0xd7f   : > { %3982 = vmatpush3.bf16.msra.mxu0 %v4399_v52 }
 0xd80   : > { %3983 = vmatprep.subr.bf16.mxu0 %v4400_v34 }
 0xd83   : > { %3984 = vmatpush3.bf16.msra.mxu0 %v4401_v53 }
 0xd84   : > { %3985 = vmatprep.subr.bf16.mxu0 %v4402_v19 }
 0xd87   : > { %3986 = vmatpush3.bf16.msra.mxu0 %v4403_v56 }
 0xd88   : > { %3987 = vmatprep.subr.bf16.mxu0 %v4404_v57 }
 0xe49   : > { %v2814_v60 = vpop.f32.mrb[12].mxu0 }
 0xe4a   : > { %v2815_v63 = vadd.f32 %v3855_v59, %v2814_v60  ;;  %v4135_v1 = vpop.f32.mrb[13].mxu0  ;;  %v4406_v60 = vld [vmem:[%s5389_s2 + $0x70] sm:$0xff]  }
 0xe4b   : > { %v2817_v2 = vpop.f32.mrb[14].mxu0  ;;  %v4408_v1 = vld [vmem:[%s5389_s2 + $0x78] sm:$0xff]  }
 0xe4c   : > { %v2818_v3 = vadd.f32 %v3855_v59, %v2817_v2  ;;  %v4136_v4 = vpop.f32.mrb[15].mxu0  ;;  %v2821_v5 = vadd.f32 %v2815_v63, %v5482_v54  ;;  %v4405_v59 = vld [vmem:[%s5389_s2 + $0x28] sm:$0xff]   ;;  %v4407_v63 = vld [vmem:[%s5389_s2 + $0x30] sm:$0xff]   ;;  %v4409_v2 = vld [vmem:[%s5389_s2 + $0x38] sm:$0xff]  }
 0xe4d   : > { %3988 = vmatpush3.bf16.msra.mxu0 %v4405_v59 }
 0xe4e   : > { %2825 = vadd.xlane.f32.xlu1 %v2821_v5  ;;  %v2822_v6 = vadd.f32 %v2818_v3, %v5484_v55  ;;  %3989 = vmatprep.subr.bf16.mxu0 %v4406_v60  ;;  %v2881_v3 = vld [vmem:[%s5429_s20] sm:$0x3] }
 0xe4f   : > { %v2886_v4 = vrot.slane %v2881_v3, %v1122_v0 }
 0xe50   : > { %2827 = vadd.xlane.f32.xlu0 %v2822_v6 }
 0xe51   : > { %3990 = vmatpush3.bf16.msra.mxu0 %v4407_v63 }
 0xe52   : > { %3991 = vmatprep.subr.bf16.mxu0 %v4408_v1 }
 0xe55   : > { %3992 = vmatpush3.bf16.msra.mxu0 %v4409_v2 }
 0xedb   : > { %v2826_v13 = vpop.xlane.xlu1 %2825 }
 0xedc   : > { %v2830_v15 = vmul.f32 0.0078125, %v2826_v13 }
 0xedd   : > { %v2828_v16 = vpop.xlane.xlu0 %2827 }
 0xede   : > { %v2832_v54 = vsub.f32 %v2821_v5, %v2830_v15  ;;  %v2831_v55 = vmul.f32 0.0078125, %v2828_v16  ;;  %v2890_v5 = vrot.slane %v2881_v3, %v1126_v62 }
 0xee0   : > { %v2833_v18 = vsub.f32 %v2822_v6, %v2831_v55  ;;  %v2834_v20 = vmul.f32 %v2832_v54, %v2832_v54 }
 0xee2   : > { %2836 = vadd.xlane.f32.xlu0 %v2834_v20  ;;  %v2835_v21 = vmul.f32 %v2833_v18, %v2833_v18 }
 0xee4   : > { %2838 = vadd.xlane.f32.xlu1 %v2835_v21 }
 0xf6f   : > { %v2837_v29 = vpop.xlane.xlu0 %2836 }
 0xf70   : > { %v2840_v30 = vmul.f32 0.0078125, %v2837_v29 }
 0xf71   : > { %v2839_v31 = vpop.xlane.xlu1 %2838 }
 0xf72   : > { %v2842_v32 = vadd.f32 1e-12, %v2840_v30  ;;  %v2841_v35 = vmul.f32 0.0078125, %v2839_v31 }
 0xf74   : > { %4442 = vrsqrt.f32 %v2842_v32  ;;  %v2843_v36 = vadd.f32 1e-12, %v2841_v35 }
 0xf76   : > { %4444 = vrsqrt.f32 %v2843_v36 }
 0xf7e   : > { %v4443_v37 = vpop.eup %4442 }
 0xf7f   : > { %v2846_v38 = vmul.f32 %v4443_v37, %v2832_v54 }
 0xf80   : > { %v4445_v39 = vpop.eup %4444 }
 0xf81   : > { %v2847_v40 = vmul.f32 %v4445_v39, %v2833_v18  ;;  %v2854_v41 = vmul.f32 %v3864_v33, %v2846_v38 }
 0xf83   : > { %v2855_v43 = vmul.f32 %v3864_v33, %v2847_v40  ;;  %v5743_v44 = vadd.f32 %v3865_v42, %v2854_v41 }
 0xf85   : > { %v5745_v45 = vadd.f32 %v3865_v42, %v2855_v43 }
 0xf87   : > { %v2864_v46 = vpack.c.bf16 %v5745_v45, %v5743_v44 }
 0xf89   : > { %3006 = vmatmul.mubr.bf16.vlgmr.msra.gmra.mrb[28].mxu1 %v2864_v46 }
0x105c   : > { %v3007_v6 = vpop.f32.mrb[28].mxu1 }
0x105d   : > { %v3008_v7 = vadd.f32 %v3007_v6, %v2886_v4  ;;  %v3009_v9 = vpop.f32.mrb[29].mxu1 }
0x105e   : > { %v3010_v10 = vadd.f32 %v3009_v9, %v2890_v5  ;;  %v3011_v12 = vpop.f32.mrb[30].mxu1 }
0x105f   : > { %v3016_v13 = vmul.f32 %v3008_v7, %v3008_v7  ;;  %v3012_v15 = vadd.f32 %v3011_v12, %v2886_v4  ;;  %v3013_v16 = vpop.f32.mrb[31].mxu1 }
0x1060   : > { %v3017_v54 = vmul.f32 %v3010_v10, %v3010_v10  ;;  %v3014_v55 = vadd.f32 %v3013_v16, %v2890_v5 }
0x1061   : > { %v3020_v18 = vmul.f32 %v3016_v13, %v3008_v7  ;;  %v3018_v20 = vmul.f32 %v3012_v15, %v3012_v15 }
0x1062   : > { %v3021_v21 = vmul.f32 %v3017_v54, %v3010_v10  ;;  %v3019_v22 = vmul.f32 %v3014_v55, %v3014_v55  ;;  %v3899_v54 = vld [vmem:[%s1001_s12] ss:$0 sm:$0xff] }
0x1063   : > { %v3024_v14 = vmul.f32 0.044715, %v3020_v18  ;;  %v3022_v58 = vmul.f32 %v3018_v20, %v3012_v15  ;;  %v3900_v20 = vld [vmem:[%s1004_s3] ss:$0 sm:$0xff] }
0x1064   : > { %v3025_v0 = vmul.f32 0.044715, %v3021_v21  ;;  %v3023_v23 = vmul.f32 %v3019_v22, %v3014_v55 }
0x1065   : > { %v3028_v61 = vadd.f32 %v3024_v14, %v3008_v7  ;;  %v3026_v62 = vmul.f32 0.044715, %v3022_v58 }
0x1066   : > { %v3029_v24 = vadd.f32 %v3025_v0, %v3010_v10  ;;  %v3027_v25 = vmul.f32 0.044715, %v3023_v23  ;;  %v4458_v23 = vld [vmem:[#allocation15] sm:$0xff] (!%p3901_p12)  }
0x1067   : > { %v3032_v8 = vmul.f32 0.7978846, %v3028_v61  ;;  %v3030_v11 = vadd.f32 %v3026_v62, %v3012_v15  ;;  %v4893_v61 = vmov (!%p3901_p12), 0.0   ;;  %v4459_v62 = vld [vmem:[#allocation15 + $0x8] sm:$0xff] (!%p3901_p12)  }
0x1068   : > { %v3033_v26 = vmul.f32 0.7978846, %v3029_v24  ;;  %v3031_v27 = vadd.f32 %v3027_v25, %v3014_v55  ;;  %4137 = vmatprep.subr.bf16.mxu0 (!%p3901_p12), %v4893_v61  ;;  %4157 = vmatprep.subr.bf16.mxu1 (!%p3901_p12), %v4893_v61  ;;  %v4460_v24 = vld [vmem:[#allocation15 + $0x10] sm:$0xff] (!%p3901_p12)   ;;  %v4466_v25 = vld [vmem:[#allocation18] sm:$0xff] (!%p3901_p12)  }
0x1069   : > { %4446 = vtanh.f32 %v3032_v8  ;;  %v3034_v17 = vmul.f32 0.7978846, %v3030_v11  ;;  %4173 = vmatprep.mubr.msk.bf16.mxu1 (!%p3901_p12), %vm4894_vm6, %v4893_v61  ;;  %v4461_v8 = vld [vmem:[#allocation15 + $0x18] sm:$0xff] (!%p3901_p12)   ;;  %4158 = vmatpush3.bf16.msra.mxu1 (!%p3901_p12), %v4466_v25  ;;  %v4467_v11 = vld [vmem:[#allocation18 + $0x8] sm:$0xff] (!%p3901_p12)  }
0x106a   : > { %4448 = vtanh.f32 %v3033_v26  ;;  %v3035_v28 = vmul.f32 0.7978846, %v3031_v27  ;;  %4159 = vmatprep.subr.bf16.mxu1 (!%p3901_p12), %v4893_v61  ;;  %v4462_v26 = vld [vmem:[#allocation15 + $0x20] sm:$0xff] (!%p3901_p12)   ;;  %v4468_v27 = vld [vmem:[#allocation18 + $0x10] sm:$0xff] (!%p3901_p12)  }
0x106b   : > { %4450 = vtanh.f32 %v3034_v17  ;;  %v4463_v17 = vld [vmem:[#allocation15 + $0x28] sm:$0xff] (!%p3901_p12)  }
0x106c   : > { %4452 = vtanh.f32 %v3035_v28  ;;  %v4469_v28 = vld [vmem:[#allocation18 + $0x18] sm:$0xff] (!%p3901_p12)  }
0x106d   : > { %4160 = vmatpush3.bf16.msra.mxu1 (!%p3901_p12), %v4467_v11 }
0x106e   : > { %4161 = vmatprep.subr.bf16.mxu1 (!%p3901_p12), %v4893_v61 }
0x1071   : > { %4162 = vmatpush3.bf16.msra.mxu1 (!%p3901_p12), %v4468_v27 }
0x1072   : > { %4163 = vmatprep.subr.bf16.mxu1 (!%p3901_p12), %v4893_v61 }
0x1073   : > { %v4447_v29 = vpop.eup %4446 }
0x1074   : > { %v4449_v30 = vpop.eup %4448  ;;  %v3040_v31 = vadd.f32 1.0, %v4447_v29  ;;  %v4464_v29 = vld [vmem:[#allocation15 + $0x30] sm:$0xff] (!%p3901_p12)  }
0x1075   : > { %v4451_v32 = vpop.eup %4450  ;;  %v3041_v35 = vadd.f32 1.0, %v4449_v30  ;;  %4164 = vmatpush3.bf16.msra.mxu1 (!%p3901_p12), %v4469_v28 }
0x1076   : > { %v4453_v36 = vpop.eup %4452  ;;  %v3044_v37 = vmul.f32 0.5, %v3040_v31  ;;  %v3042_v33 = vadd.f32 1.0, %v4451_v32  ;;  %v4470_v31 = vld [vmem:[#allocation18 + $0x20] sm:$0xff] (!%p3901_p12)   ;;  %4165 = vmatprep.subr.bf16.mxu1 (!%p3901_p12), %v4893_v61  ;;  %v4465_v32 = vld [vmem:[#allocation15 + $0x38] sm:$0xff] (!%p3901_p12)  }
0x1077   : > { %v3043_v38 = vadd.f32 1.0, %v4453_v36  ;;  %v3045_v39 = vmul.f32 0.5, %v3041_v35  ;;  %v4471_v36 = vld [vmem:[#allocation18 + $0x28] sm:$0xff] (!%p3901_p12)  }
0x1078   : > { %v3046_v40 = vmul.f32 0.5, %v3042_v33  ;;  %v3048_v42 = vmul.f32 %v3044_v37, %v3008_v7  ;;  %v4472_v33 = vld [vmem:[#allocation18 + $0x30] sm:$0xff] (!%p3901_p12)  }
0x1079   : > { %v3047_v41 = vmul.f32 0.5, %v3043_v38  ;;  %v3049_v46 = vmul.f32 %v3045_v39, %v3010_v10  ;;  %4166 = vmatpush3.bf16.msra.mxu1 (!%p3901_p12), %v4470_v31  ;;  %v4473_v38 = vld [vmem:[#allocation18 + $0x38] sm:$0xff] (!%p3901_p12)  }
0x107a   : > { %v3050_v43 = vmul.f32 %v3046_v40, %v3012_v15  ;;  %4167 = vmatprep.subr.bf16.mxu1 (!%p3901_p12), %v4893_v61  ;;  %v3902_v39 = vld [vmem:[#allocation16] ss:$0 sm:$0xff] (!%p3901_p12) }
0x107b   : > { %v3051_v47 = vmul.f32 %v3047_v41, %v3014_v55 }
0x107c   : > { %v3052_v48 = vpack.c.bf16 %v3050_v43, %v3048_v42 }
0x107d   : > { %v3053_v49 = vpack.c.bf16 %v3051_v47, %v3049_v46  ;;  %4168 = vmatpush3.bf16.msra.mxu1 (!%p3901_p12), %v4471_v36 }
0x107e   : > { %4169 = vmatprep.subr.bf16.mxu1 (!%p3901_p12), %v4893_v61 }
0x107f   : > { %3221 = vmatprep.mubr.bf16.mxu0 %v3053_v49  ;;  %v3911_v49 = vld [vmem:[#allocation19] ss:$0 sm:$0xff] (!%p3901_p12) }
0x1080   : > { %3222 = vmatmul.mubr.bf16.vlgmr.msra.gmra.mrb[16].mxu0 %v3052_v48 }
0x1081   : > { %4138 = vmatpush3.bf16.msra.mxu0 (!%p3901_p12), %v4458_v23  ;;  %4153 = vmatprep.mubr.msk.bf16.mxu0 (!%p3901_p12), %vm4894_vm6, %v4893_v61 }
0x1082   : > { %4139 = vmatprep.subr.bf16.mxu0 (!%p3901_p12), %v4893_v61  ;;  %4170 = vmatpush3.bf16.msra.mxu1 (!%p3901_p12), %v4472_v33 }
0x1083   : > { %4171 = vmatprep.subr.bf16.mxu1 (!%p3901_p12), %v4893_v61 }
0x1085   : > { %4140 = vmatpush3.bf16.msra.mxu0 (!%p3901_p12), %v4459_v62 }
0x1086   : > { %4141 = vmatprep.subr.bf16.mxu0 (!%p3901_p12), %v4893_v61  ;;  %4172 = vmatpush3.bf16.msra.mxu1 (!%p3901_p12), %v4473_v38 }
0x1089   : > { %4142 = vmatpush3.bf16.msra.mxu0 (!%p3901_p12), %v4460_v24 }
0x108a   : > { %4143 = vmatprep.subr.bf16.mxu0 (!%p3901_p12), %v4893_v61 }
0x108d   : > { %4144 = vmatpush3.bf16.msra.mxu0 (!%p3901_p12), %v4461_v8 }
0x108e   : > { %4145 = vmatprep.subr.bf16.mxu0 (!%p3901_p12), %v4893_v61 }
0x1091   : > { %4146 = vmatpush3.bf16.msra.mxu0 (!%p3901_p12), %v4462_v26 }
0x1092   : > { %4147 = vmatprep.subr.bf16.mxu0 (!%p3901_p12), %v4893_v61 }
0x1095   : > { %4148 = vmatpush3.bf16.msra.mxu0 (!%p3901_p12), %v4463_v17 }
0x1096   : > { %4149 = vmatprep.subr.bf16.mxu0 (!%p3901_p12), %v4893_v61 }
0x1099   : > { %4150 = vmatpush3.bf16.msra.mxu0 (!%p3901_p12), %v4464_v29 }
0x109a   : > { %4151 = vmatprep.subr.bf16.mxu0 (!%p3901_p12), %v4893_v61 }
0x109d   : > { %4152 = vmatpush3.bf16.msra.mxu0 (!%p3901_p12), %v4465_v32 }
0x1153   : > { %v3993_v50 = vpop.f32.mrb[16].mxu0 }
0x1154   : > { %v3994_v52 = vpop.f32.mrb[17].mxu0 }
0x1155   : > { %v3995_v34 = vadd.f32 %v3994_v52, %v3993_v50  ;;  %v3996_v53 = vpop.f32.mrb[18].mxu0 }
0x1156   : > { %v3997_v19 = vpop.f32.mrb[19].mxu0 }
0x1157   : > { %v3224_v56 = vadd.f32 %v3995_v34, %v3882_v51  ;;  %v3998_v57 = vadd.f32 %v3997_v19, %v3996_v53 }
0x1159   : > { %v3227_v59 = vadd.f32 %v3998_v57, %v3882_v51  ;;  %v3230_v60 = vadd.f32 %v3224_v56, %v5743_v44 }
0x115b   : > { %3234 = vadd.xlane.f32.xlu0 %v3230_v60  ;;  %v3231_v63 = vadd.f32 %v3227_v59, %v5745_v45 }
0x115d   : > { %3236 = vadd.xlane.f32.xlu1 %v3231_v63 }
0x11e8   : > { %v3235_v1 = vpop.xlane.xlu0 %3234 }
0x11e9   : > { %v3238_v2 = vmul.f32 0.0078125, %v3235_v1 }
0x11ea   : > { %v3237_v3 = vpop.xlane.xlu1 %3236 }
0x11eb   : > { %v3240_v4 = vsub.f32 %v3230_v60, %v3238_v2  ;;  %v3239_v5 = vmul.f32 0.0078125, %v3237_v3 }
0x11ed   : > { %v3241_v6 = vsub.f32 %v3231_v63, %v3239_v5  ;;  %v3242_v7 = vmul.f32 %v3240_v4, %v3240_v4 }
0x11ef   : > { %3244 = vadd.xlane.f32.xlu0 %v3242_v7  ;;  %v3243_v9 = vmul.f32 %v3241_v6, %v3241_v6 }
0x11f1   : > { %3246 = vadd.xlane.f32.xlu1 %v3243_v9 }
0x127c   : > { %v3245_v10 = vpop.xlane.xlu0 %3244 }
0x127d   : > { %v3248_v12 = vmul.f32 0.0078125, %v3245_v10 }
0x127e   : > { %v3247_v13 = vpop.xlane.xlu1 %3246 }
0x127f   : > { %v3250_v44 = vadd.f32 1e-12, %v3248_v12  ;;  %v3249_v15 = vmul.f32 0.0078125, %v3247_v13 }
0x1281   : > { %4454 = vrsqrt.f32 %v3250_v44  ;;  %v3251_v45 = vadd.f32 1e-12, %v3249_v15 }
0x1283   : > { %4456 = vrsqrt.f32 %v3251_v45 }
0x128b   : > { %v4455_v16 = vpop.eup %4454 }
0x128c   : > { %v3254_v55 = vmul.f32 %v4455_v16, %v3240_v4 }
0x128d   : > { %v4457_v18 = vpop.eup %4456 }
0x128e   : > { %v3262_v21 = vmul.f32 %v3899_v54, %v3254_v55  ;;  %v3255_v22 = vmul.f32 %v4457_v18, %v3241_v6  ;;  %3277 = sbr.rel (%p3901_p12) target bundleno = 5194 (0x144a), region = 163 }
0x1290   : > { %v3270_v14 = vadd.f32 %v3900_v20, %v3262_v21  ;;  %v3263_v58 = vmul.f32 %v3899_v54, %v3255_v22 }
0x1292   : > { %3272 = vst [vmem:[#allocation2] sm:$0xff] %v3270_v14  ;;  %v3271_v0 = vadd.f32 %v3900_v20, %v3263_v58 }
0x1294   : > { %3273 = vst [vmem:[#allocation2 + $0x8] sm:$0xff] %v3271_v0  ;;  %v3279_v30 = vrot.slane (!%p3901_p12), %v3271_v0, 7 }
0x1296   : > { %v3282_v35 = vsel %vm3281_vm7, %v3270_v14, %v3279_v30 }
0x1297   : > { %v3283_v37 = vpack.c.bf16 %v3282_v35, %v3282_v35 }
0x1299   : > { %4154 = vmatmul.mubr.bf16.vlgmr.msra.gmra.mrb[0].mxu0 %v3283_v37 }
0x136c   : > { %v3389_v40 = vpop.f32.mrb[0].mxu0 }
0x136d   : > { %v3390_v41 = vadd.f32 %v3902_v39, %v3389_v40  ;;  %v4155_v42 = vpop.f32.mrb[1].mxu0 }
0x136e   : > { %v3392_v43 = vpop.f32.mrb[2].mxu0 }
0x136f   : > { %v3395_v46 = vmax.f32 %v3390_v41, 0.0  ;;  %v4156_v47 = vpop.f32.mrb[3].mxu0 }
0x1371   : > { %v3396_v48 = vpack.c.bf16 %v3395_v46, %v3395_v46 }
0x1373   : > { %4174 = vmatmul.mubr.bf16.vlgmr.msra.gmra.mrb[0].mxu1 %v3396_v48 }
0x1446   : > { %v3502_v50 = vpop.f32.mrb[0].mxu1 }
0x1447   : > { %v3503_v51 = vadd.f32 %v3911_v49, %v3502_v50  ;;  %v4175_v52 = vpop.f32.mrb[1].mxu1 }
0x1448   : > { %v3505_v34 = vpop.f32.mrb[2].mxu1 }
0x1449   : > { %3508 = vst [vmem:[#allocation21] sm:$0x3] %v3503_v51  ;;  %v4176_v53 = vpop.f32.mrb[3].mxu1 }
0x144a PF: > { %p4262_p7 = scmp.eq.s32.totalorder %s5040_s7, 1  ;;  %s4895_s8 = smov [#allocation21]  }
0x144b   : > { %s3516_s12 = sshll.u32 %s4895_s8, 4  ;;  %s3517_s12 = int_to_ptr.vmem [resolvable:$true] %s3516_s12 }
0x144c   : > { %s4774_s3 = scalar_lea.vmem %s3517_s12, 32  ;;  %p4781_p10 = scmp.lt.s32.totalorder %s3517_s12, %s3517_s12 }
0x144d   : > { %p4775_p2 = scmp.ne.s32.totalorder %s3517_s12, %s4774_s3  ;;  %p4782_p8 = scmp.lt.s32.totalorder %s4774_s3, %s4774_s3 }
0x144f   : > { %p4776_p1 = pnand %p4775_p2, %p4262_p7  ;;  %p4783_p0 = por %p4782_p8, %p4781_p10 }
0x1451   : > { %p4777_p5 = pneg %p4776_p1 }
0x1453   : > { %p4784_p9 = pnand %p4783_p0, %p4777_p5 }
0x1455   : > { %4787 = shalt.err (!%p4784_p9)
}
0x1456   : > { %s5971_s13 = sld [smem:[#allocation55_spill]] }
0x145c   : > { %s4788_s4 = scalar_lea.hbm %s5971_s13, 32 }
0x145d   : > { %p4789_p4 = scmp.ne.s32.totalorder %s5971_s13, %s4788_s4  ;;  %p4794_p13 = scmp.lt.u32.totalorder %s4788_s4, %s5971_s13 }
0x145f   : > { %p4790_p11 = pnand %p4789_p4, %p4262_p7 }
0x1461   : > { %p4791_p3 = pneg %p4790_p11 }
0x1463   : > { %p4796_p6 = pnand %p4794_p13, %p4791_p3 }
0x1465   : > { %4799 = shalt.err (!%p4796_p6)
}
0x1466   : > { %4214 = dma.vmem_to_hbm [thread:$0]  (%p4262_p7), %s3517_s12, 32, %s5971_s13, [#allocation8]  }
0x1467   : > { %4847 = dma.done.wait (%p4262_p7), [#allocation8], 32  }
0x1468   : > { %4849 = vsyncadd (%p4262_p7), [#allocation8], 4294967264 }
0x1469 PF: > { %s5972_s6 = sld [smem:[#allocation31_spill]]  ;;  %s5973_s30 = sld [smem:[#allocation30_spill]] }
0x146a   : > { %s5974_s2 = sld [smem:[#allocation32_spill]]  ;;  %s5975_s1 = smov %s4856_s26 }
0x146f   : > { %p41_p12 = scmp.ge.s32.totalorder %s5972_s6, 4   ;;  %s5976_s26 = smov %s5973_s30 }
0x1471   :  { %43 = sbr.rel (!%p41_p12) target bundleno = 40 (0x28), region = 254 }
0x1478   :  { %3529 = vsyncpa [#allocation7], 1 }
0x1479   :  { %3531 = vsyncpa [#allocation7 + $0x1], 1 }
0x147a   :  { %3532 = vsyncpa [#allocation10], 1 }
0x147b   :  { %3533 = vsyncpa [#allocation17], 1 }
0x147c   :  { %3534 = vsyncpa [#allocation20], 1 }
0x147d   :  { %3535 = vsyncpa [#allocation8], 1 }
0x147e   :  { %3537 = vsyncpa [#allocation8 + $0x1], 1 }

</bundles_post_ra>
